<compile_context>
chip_gen: v7x
topology: tpu7x:2x2x1
jax: 0.10.0
libtpu: 0.0.40
codegen_flags: <defaults>
</compile_context>

<pallas_src>
import functools

import jax
import jax.numpy as jnp
from jax.experimental import pallas as pl
from jax.experimental.pallas import tpu as pltpu


def _round_up(v, m):
    return ((v + m - 1) // m) * m


def _vmem_limit_bytes():
    # ~48 MiB on v7x (64 MiB physical), capped at 100 MiB on v5e/v6e (128 MiB physical).
    try:
        cap = int(pltpu.get_tpu_info().vmem_capacity_bytes)
    except Exception:
        cap = 128 * 1024 * 1024
    return min(cap * 3 // 4, 100 * 1024 * 1024)


def _layernorm(v, g, b, inv_d, col_mask, eps=1e-5):
    """LayerNorm over a zero-padded lane dim, centered (two-pass) variance.

    Statistics use the true feature count: `col_mask` zeroes the centered values on padded
    columns so they don't pollute the variance.  Padded gamma/beta are zero, so padded
    output columns stay exactly zero.  Matches torch.nn.LayerNorm (biased var, eps=1e-5).
    """
    mu = jnp.sum(v, axis=-1, keepdims=True) * inv_d
    cd = v - mu
    if col_mask is not None:
        cd = cd * col_mask
    var = jnp.sum(cd * cd, axis=-1, keepdims=True) * inv_d
    return cd * jax.lax.rsqrt(var + eps) * g + b


def transformer_block_kernel(
    x_ref,                            # (1, Np, Dp)  full padded sequence (revisited over t)
    wq_ref, wk_ref, wv_ref,           # (Dp, H*dhp)  attention scale already folded into wq
    wo_ref, bo_ref,                   # (H*dhp, Dp), (1, Dp)
    g1_ref, b1_ref, g2_ref, b2_ref,   # (1, Dp)
    wff1_ref, bff1_ref,               # (Dp, Mp), (1, Mp)
    wff2_ref, bff2_ref,               # (Mp, Dp), (1, Dp)
    o_ref,                            # (1, TQ, Dp)  output query tile
    k_scr, v_scr,                     # (H, Np, dhp) VMEM scratch (compute dtype)
    *, heads, dhp, n_true, d_true, tq,
):
    t = pl.program_id(1)
    n_pad = x_ref.shape[1]
    d_pad = x_ref.shape[2]
    inner_pad = heads * dhp
    cdt = wq_ref.dtype                      # matmul/compute dtype (bf16 or f32)
    approx = (cdt == jnp.bfloat16)          # EUP approx reciprocal only on the bf16 path
    inv_d = jnp.float32(1.0 / d_true)

    col_mask = None
    if d_true != d_pad:
        col_mask = (jax.lax.broadcasted_iota(jnp.int32, (1, d_pad), 1)
                    < d_true).astype(jnp.float32)

    # ---- once per sequence (t == 0): LN1 + K/V projections, chunked over rows ----
    @pl.when(t == 0)
    def _():
        def kv_chunk(c, carry):
            r0 = pl.multiple_of(c * tq, tq)
            xc = x_ref[0, pl.ds(r0, tq), :].astype(jnp.float32)          # (tq, Dp)
            hc = _layernorm(xc, g1_ref[...], b1_ref[...], inv_d, col_mask).astype(cdt)
            kc = jnp.dot(hc, wk_ref[...], preferred_element_type=jnp.float32)
            vc = jnp.dot(hc, wv_ref[...], preferred_element_type=jnp.float32)
            k_scr[:, pl.ds(r0, tq), :] = jnp.transpose(
                kc.astype(cdt).reshape(tq, heads, dhp), (1, 0, 2))
            v_scr[:, pl.ds(r0, tq), :] = jnp.transpose(
                vc.astype(cdt).reshape(tq, heads, dhp), (1, 0, 2))
            return carry

        jax.lax.fori_loop(0, n_pad // tq, kv_chunk, 0)

    # ---- per query tile ----
    row0 = pl.multiple_of(t * tq, tq)
    xq = x_ref[0, pl.ds(row0, tq), :].astype(jnp.float32)                # (TQ, Dp)
    h1 = _layernorm(xq, g1_ref[...], b1_ref[...], inv_d, col_mask).astype(cdt)

    # Q projection for this tile (scale pre-folded into wq on the host).
    q = jnp.dot(h1, wq_ref[...], preferred_element_type=jnp.float32)     # (TQ, H*dhp)
    q = jnp.transpose(q.astype(cdt).reshape(tq, heads, dhp), (1, 0, 2))  # (H, TQ, dhp)

    dots = jnp.einsum("hqd,hkd->hqk", q, k_scr[...],
                      preferred_element_type=jnp.float32)                # (H, TQ, Np)
    if n_pad != n_true:
        kmask = jax.lax.broadcasted_iota(jnp.int32, (1, 1, n_pad), 2) < n_true
        dots = jnp.where(kmask, dots, jnp.float32(-1e30))                # mask padded keys
    dots = dots - jnp.max(dots, axis=-1, keepdims=True)
    p = jnp.exp(dots)
    p = p * pl.reciprocal(jnp.sum(p, axis=-1, keepdims=True), approx=approx)
    ctx = jnp.einsum("hqk,hkd->hqd", p.astype(cdt), v_scr[...],
                     preferred_element_type=jnp.float32)                 # (H, TQ, dhp)
    ctx = jnp.transpose(ctx.astype(cdt), (1, 0, 2)).reshape(tq, inner_pad)
    attn = jnp.dot(ctx, wo_ref[...], preferred_element_type=jnp.float32) + bo_ref[...]

    xr = xq + attn                                                       # residual 1 (f32)

    # ---- feed-forward: single (TQ,Mp) GELU activation + one deep-K matmul ----
    h2 = _layernorm(xr, g2_ref[...], b2_ref[...], inv_d, col_mask).astype(cdt)
    f = jnp.dot(h2, wff1_ref[...], preferred_element_type=jnp.float32) + bff1_ref[...]
    f = f * 0.5 * (1.0 + jax.lax.erf(f * jnp.float32(0.7071067811865476)))   # exact GELU
    # Dropout(p=0.0) is identity -> nothing to do.
    ff = jnp.dot(f.astype(cdt), wff2_ref[...],
                 preferred_element_type=jnp.float32) + bff2_ref[...]

    o_ref[0] = (xr + ff).astype(o_ref.dtype)                             # residual 2


def _resident_weight_spec(shape):
    """Full-array weight block, constant index_map, single-buffered."""
    try:
        return pl.BlockSpec(shape, lambda b, t: (0, 0), pipeline_mode=pl.Buffered(1))
    except TypeError:   # older BlockSpec signature without pipeline_mode
        return pl.BlockSpec(shape, lambda b, t: (0, 0))


def transformer_block(x, params, *, heads, dim_head, compute_dtype=jnp.bfloat16):
    B, N, D = x.shape
    mlp_dim = params["w_ff1"].shape[1]
    scale = float(dim_head) ** (-0.5)

    Dp = _round_up(D, 128)                # lane-dense embedding dim
    Mp = _round_up(mlp_dim, 128)          # lane-dense MLP hidden dim
    dhp = _round_up(dim_head, 128)        # lane-dense per-head dim (zero-padded)
    inner_pad = heads * dhp

    tq = min(128, _round_up(N, 8))        # query tile capped at 128
    Np = _round_up(N, tq)                 # padded token count (padded keys masked in kernel)

    def pad2(a, rows, cols, dtype):
        a = a.astype(dtype)
        return jnp.pad(a, ((0, rows - a.shape[0]), (0, cols - a.shape[1])))

    def pad_in_heads(w, dtype):           # (D, heads*dim_head) -> (Dp, heads*dhp)
        w = w.astype(dtype).reshape(D, heads, dim_head)
        w = jnp.pad(w, ((0, Dp - D), (0, 0), (0, dhp - dim_head)))
        return w.reshape(Dp, inner_pad)

    def pad_out_heads(w, dtype):          # (heads*dim_head, D) -> (heads*dhp, Dp)
        w = w.astype(dtype).reshape(heads, dim_head, D)
        w = jnp.pad(w, ((0, 0), (0, dhp - dim_head), (0, Dp - D)))
        return w.reshape(inner_pad, Dp)

    wq, wk, wv = jnp.split(params["w_qkv"], 3, axis=1)
    weights = [
        pad_in_heads(wq * scale, compute_dtype),      # scale folded into wq
        pad_in_heads(wk, compute_dtype),
        pad_in_heads(wv, compute_dtype),
        pad_out_heads(params["w_out"], compute_dtype),
        pad2(params["b_out"], 1, Dp, jnp.float32),
        pad2(params["g1"], 1, Dp, jnp.float32),
        pad2(params["b1"], 1, Dp, jnp.float32),
        pad2(params["g2"], 1, Dp, jnp.float32),
        pad2(params["b2"], 1, Dp, jnp.float32),
        pad2(params["w_ff1"], Dp, Mp, compute_dtype),
        pad2(params["b_ff1"], 1, Mp, jnp.float32),
        pad2(params["w_ff2"], Mp, Dp, compute_dtype),
        pad2(params["b_ff2"], 1, Dp, jnp.float32),
    ]
    x_p = jnp.pad(x, ((0, 0), (0, Np - N), (0, Dp - D)))

    kernel = functools.partial(
        transformer_block_kernel,
        heads=heads, dhp=dhp, n_true=N, d_true=D, tq=tq,
    )

    in_specs = [pl.BlockSpec((1, Np, Dp), lambda b, t: (b, 0, 0))]
    in_specs += [_resident_weight_spec(w.shape) for w in weights]
    out_specs = pl.BlockSpec((1, tq, Dp), lambda b, t: (b, t, 0))

    flops = B * (2 * Np * Dp * 3 * inner_pad          # Q/K/V projections
                 + 4 * heads * Np * Np * dhp          # QK^T + PV
                 + 2 * Np * inner_pad * Dp            # out projection
                 + 4 * Np * Dp * Mp)                  # MLP
    transcendentals = B * (heads * Np * Np + Np * Mp)
    bytes_accessed = (2 * int(x_p.size) * x_p.dtype.itemsize
                      + sum(int(w.size) * w.dtype.itemsize for w in weights))

    out = pl.pallas_call(
        kernel,
        out_shape=jax.ShapeDtypeStruct((B, Np, Dp), x.dtype),
        grid=(B, Np // tq),
        in_specs=in_specs,
        out_specs=out_specs,
        scratch_shapes=[
            pltpu.VMEM((heads, Np, dhp), compute_dtype),   # K (lane-dense head dim)
            pltpu.VMEM((heads, Np, dhp), compute_dtype),   # V
        ],
        compiler_params=pltpu.CompilerParams(
            # batch axis is independent (megacore-parallel); the query-tile axis carries the
            # per-sequence K/V scratch, so it must stay "arbitrary".
            dimension_semantics=("parallel", "arbitrary"),
            vmem_limit_bytes=_vmem_limit_bytes(),
        ),
        cost_estimate=pl.CostEstimate(
            flops=flops, transcendentals=transcendentals, bytes_accessed=bytes_accessed),
    )(x_p, *weights)
    return out[:, :N, :D]


def reference_block(x, params, *, heads, dim_head):
    """Pure-JAX f32 reference mirroring the PyTorch forward."""
    def ln(v, g, b):
        mu = jnp.mean(v, axis=-1, keepdims=True)
        var = jnp.mean((v - mu) ** 2, axis=-1, keepdims=True)
        return (v - mu) / jnp.sqrt(var + 1e-5) * g + b

    B, N, D = x.shape
    inner = heads * dim_head
    h1 = ln(x, params["g1"], params["b1"])
    qkv = h1 @ params["w_qkv"]
    q, k, v = jnp.split(qkv, 3, axis=-1)

    def split_heads(t):
        return t.reshape(B, N, heads, dim_head).transpose(0, 2, 1, 3)

    q, k, v = map(split_heads, (q, k, v))
    dots = jnp.einsum("bhid,bhjd->bhij", q, k) * (dim_head ** -0.5)
    attn = jax.nn.softmax(dots, axis=-1)
    out = jnp.einsum("bhij,bhjd->bhid", attn, v)
    out = out.transpose(0, 2, 1, 3).reshape(B, N, inner)
    out = out @ params["w_out"] + params["b_out"]
    x = x + out
    h2 = ln(x, params["g2"], params["b2"])
    ff = h2 @ params["w_ff1"] + params["b_ff1"]
    ff = jax.nn.gelu(ff, approximate=False)
    ff = ff @ params["w_ff2"] + params["b_ff2"]
    return x + ff


def init_params(key, dim, heads, dim_head, mlp_dim):
    inner = heads * dim_head
    ks = jax.random.split(key, 6)
    scale = 0.05
    return {
        # Linear weights already transposed to (in, out) so kernel does x @ W.
        "w_qkv": scale * jax.random.normal(ks[0], (dim, 3 * inner), jnp.float32),
        "w_out": scale * jax.random.normal(ks[1], (inner, dim), jnp.float32),
        "b_out": scale * jax.random.normal(ks[2], (1, dim), jnp.float32),
        "g1": jnp.ones((1, dim), jnp.float32),
        "b1": jnp.zeros((1, dim), jnp.float32),
        "g2": jnp.ones((1, dim), jnp.float32),
        "b2": jnp.zeros((1, dim), jnp.float32),
        "w_ff1": scale * jax.random.normal(ks[3], (dim, mlp_dim), jnp.float32),
        "b_ff1": scale * jax.random.normal(ks[4], (1, mlp_dim), jnp.float32),
        "w_ff2": scale * jax.random.normal(ks[5], (mlp_dim, dim), jnp.float32),
        "b_ff2": jnp.zeros((1, dim), jnp.float32),
    }


if __name__ == "__main__":
    B, N = 2, 8
    dim, heads, dim_head, mlp_dim = 32, 4, 8, 64

    key = jax.random.PRNGKey(0)
    kx, kp = jax.random.split(key)
    x = jax.random.normal(kx, (B, N, dim), jnp.float32)
    params = init_params(kp, dim, heads, dim_head, mlp_dim)

    ref = reference_block(x, params, heads=heads, dim_head=dim_head)

    # 1) exact-precision path (f32 matmuls) -- strict semantic check vs the reference
    out_f32 = transformer_block(x, params, heads=heads, dim_head=dim_head,
                                compute_dtype=jnp.float32)
    out_f32 = jax.block_until_ready(out_f32)
    assert out_f32.shape == (B, N, dim)
    err32 = float(jnp.max(jnp.abs(out_f32 - ref)))
    assert jnp.allclose(out_f32, ref, atol=2e-3, rtol=2e-3), err32

    # 2) performance path (bf16 matmul operands / weights, f32 accumulation)
    out_bf16 = transformer_block(x, params, heads=heads, dim_head=dim_head,
                                 compute_dtype=jnp.bfloat16)
    out_bf16 = jax.block_until_ready(out_bf16)
    assert out_bf16.shape == (B, N, dim)
    errbf = float(jnp.max(jnp.abs(out_bf16 - ref)))
    assert jnp.allclose(out_bf16, ref, atol=2e-2, rtol=2e-2), errbf

    print("KERNEL_OK")
</pallas_src>

<mosaic_0001>
module attributes {stable_mosaic.version = 11 : i64} {
  func.func @transformer_block_kernel(%arg0: i32, %arg1: i32, %arg2: memref<1x8x128xf32, #tpu.memory_space<vmem>>, %arg3: memref<128x512xf32, #tpu.memory_space<vmem>>, %arg4: memref<128x512xf32, #tpu.memory_space<vmem>>, %arg5: memref<128x512xf32, #tpu.memory_space<vmem>>, %arg6: memref<512x128xf32, #tpu.memory_space<vmem>>, %arg7: memref<1x128xf32, #tpu.memory_space<vmem>>, %arg8: memref<1x128xf32, #tpu.memory_space<vmem>>, %arg9: memref<1x128xf32, #tpu.memory_space<vmem>>, %arg10: memref<1x128xf32, #tpu.memory_space<vmem>>, %arg11: memref<1x128xf32, #tpu.memory_space<vmem>>, %arg12: memref<128x128xf32, #tpu.memory_space<vmem>>, %arg13: memref<1x128xf32, #tpu.memory_space<vmem>>, %arg14: memref<128x128xf32, #tpu.memory_space<vmem>>, %arg15: memref<1x128xf32, #tpu.memory_space<vmem>>, %arg16: memref<1x8x128xf32, #tpu.memory_space<vmem>>, %arg17: memref<4x8x128xf32, #tpu.memory_space<vmem>>, %arg18: memref<4x8x128xf32, #tpu.memory_space<vmem>>) attributes {dimension_semantics = [#tpu.dimension_semantics<parallel>, #tpu.dimension_semantics<arbitrary>], iteration_bounds = array<i64: 2, 1>, scalar_prefetch = 0 : i64, scratch_operands = 2 : i64, tpu.core_type = #tpu.core_type<tc>, window_params = [{transform_indices = @transform_0, window_bounds = array<i64: 1, 8, 128>}, {pipeline_mode = #tpu.pipeline_mode<synchronous>, transform_indices = @transform_1, window_bounds = array<i64: 128, 512>}, {pipeline_mode = #tpu.pipeline_mode<synchronous>, transform_indices = @transform_2, window_bounds = array<i64: 128, 512>}, {pipeline_mode = #tpu.pipeline_mode<synchronous>, transform_indices = @transform_3, window_bounds = array<i64: 128, 512>}, {pipeline_mode = #tpu.pipeline_mode<synchronous>, transform_indices = @transform_4, window_bounds = array<i64: 512, 128>}, {pipeline_mode = #tpu.pipeline_mode<synchronous>, transform_indices = @transform_5, window_bounds = array<i64: 1, 128>}, {pipeline_mode = #tpu.pipeline_mode<synchronous>, transform_indices = @transform_6, window_bounds = array<i64: 1, 128>}, {pipeline_mode = #tpu.pipeline_mode<synchronous>, transform_indices = @transform_7, window_bounds = array<i64: 1, 128>}, {pipeline_mode = #tpu.pipeline_mode<synchronous>, transform_indices = @transform_8, window_bounds = array<i64: 1, 128>}, {pipeline_mode = #tpu.pipeline_mode<synchronous>, transform_indices = @transform_9, window_bounds = array<i64: 1, 128>}, {pipeline_mode = #tpu.pipeline_mode<synchronous>, transform_indices = @transform_10, window_bounds = array<i64: 128, 128>}, {pipeline_mode = #tpu.pipeline_mode<synchronous>, transform_indices = @transform_11, window_bounds = array<i64: 1, 128>}, {pipeline_mode = #tpu.pipeline_mode<synchronous>, transform_indices = @transform_12, window_bounds = array<i64: 128, 128>}, {pipeline_mode = #tpu.pipeline_mode<synchronous>, transform_indices = @transform_13, window_bounds = array<i64: 1, 128>}, {transform_indices = @transform_14, window_bounds = array<i64: 1, 8, 128>}]} {
    %0 = tpu.iota {dimensions = array<i32: 1>} : vector<1x128xi32>
    %c32_i32 = arith.constant 32 : i32
    %1 = vector.broadcast %c32_i32 : i32 to vector<1x128xi32>
    %2 = arith.cmpi slt, %0, %1 : vector<1x128xi32>
    %3 = arith.extui %2 : vector<1x128xi1> to vector<1x128xi32>
    %4 = arith.sitofp %3 : vector<1x128xi32> to vector<1x128xf32>
    %c0_i32 = arith.constant 0 : i32
    %5 = arith.cmpi eq, %arg1, %c0_i32 : i32
    %6 = arith.extui %5 : i1 to i32
    %cst = arith.constant 3.125000e-02 : f32
    %c0_i32_0 = arith.constant 0 : i32
    %7 = arith.cmpi ne, %6, %c0_i32_0 : i32
    scf.if %7 {
      %c0_i32_54 = arith.constant 0 : i32
      %c8_i32_55 = arith.constant 8 : i32
      %109 = arith.muli %c0_i32_54, %c8_i32_55 : i32
      %110 = tpu.assume_multiple %109, 8 : i32
      %c0_56 = arith.constant 0 : index
      %111 = arith.index_cast %110 : i32 to index
      %c0_57 = arith.constant 0 : index
      %112 = vector.load %arg2[%c0_56, %111, %c0_57] : memref<1x8x128xf32, #tpu.memory_space<vmem>>, vector<1x8x128xf32>
      %113 = vector.shape_cast %112 : vector<1x8x128xf32> to vector<8x128xf32>
      %c0_58 = arith.constant 0 : index
      %c0_59 = arith.constant 0 : index
      %114 = vector.load %arg8[%c0_58, %c0_59] : memref<1x128xf32, #tpu.memory_space<vmem>>, vector<1x128xf32>
      %c0_60 = arith.constant 0 : index
      %c0_61 = arith.constant 0 : index
      %115 = vector.load %arg9[%c0_60, %c0_61] : memref<1x128xf32, #tpu.memory_space<vmem>>, vector<1x128xf32>
      %cst_62 = arith.constant dense<0.000000e+00> : vector<8xf32>
      %116 = vector.multi_reduction <add>, %113, %cst_62 [1] : vector<8x128xf32> to vector<8xf32>
      %117 = vector.shape_cast %116 : vector<8xf32> to vector<8x1xf32>
      %118 = vector.broadcast %cst : f32 to vector<8x1xf32>
      %119 = arith.mulf %117, %118 : vector<8x1xf32>
      %120 = vector.broadcast %119 : vector<8x1xf32> to vector<8x128xf32>
      %121 = arith.subf %113, %120 : vector<8x128xf32>
      %122 = vector.broadcast %4 : vector<1x128xf32> to vector<8x128xf32>
      %123 = arith.mulf %121, %122 : vector<8x128xf32>
      %124 = arith.mulf %123, %123 : vector<8x128xf32>
      %cst_63 = arith.constant dense<0.000000e+00> : vector<8xf32>
      %125 = vector.multi_reduction <add>, %124, %cst_63 [1] : vector<8x128xf32> to vector<8xf32>
      %126 = vector.shape_cast %125 : vector<8xf32> to vector<8x1xf32>
      %127 = vector.broadcast %cst : f32 to vector<8x1xf32>
      %128 = arith.mulf %126, %127 : vector<8x1xf32>
      %cst_64 = arith.constant 9.99999974E-6 : f32
      %129 = vector.broadcast %cst_64 : f32 to vector<8x1xf32>
      %130 = arith.addf %128, %129 : vector<8x1xf32>
      %131 = math.rsqrt %130 : vector<8x1xf32>
      %132 = vector.broadcast %131 : vector<8x1xf32> to vector<8x128xf32>
      %133 = arith.mulf %123, %132 : vector<8x128xf32>
      %134 = vector.broadcast %114 : vector<1x128xf32> to vector<8x128xf32>
      %135 = arith.mulf %133, %134 : vector<8x128xf32>
      %136 = vector.broadcast %115 : vector<1x128xf32> to vector<8x128xf32>
      %137 = arith.addf %135, %136 : vector<8x128xf32>
      %c0_65 = arith.constant 0 : index
      %c0_66 = arith.constant 0 : index
      %138 = vector.load %arg4[%c0_65, %c0_66] : memref<128x512xf32, #tpu.memory_space<vmem>>, vector<128x512xf32>
      %cst_67 = arith.constant dense<0.000000e+00> : vector<8x512xf32>
      %139 = tpu.matmul %137, %138, %cst_67 {dimension_numbers = #tpu.dot_dimension_numbers<[1], [0], [0], [1], [0, 0, 1, 1], [], []>} : vector<8x128xf32>, vector<128x512xf32>, vector<8x512xf32> -> vector<8x512xf32>
      %c0_68 = arith.constant 0 : index
      %c0_69 = arith.constant 0 : index
      %140 = vector.load %arg5[%c0_68, %c0_69] : memref<128x512xf32, #tpu.memory_space<vmem>>, vector<128x512xf32>
      %cst_70 = arith.constant dense<0.000000e+00> : vector<8x512xf32>
      %141 = tpu.matmul %137, %140, %cst_70 {dimension_numbers = #tpu.dot_dimension_numbers<[1], [0], [0], [1], [0, 0, 1, 1], [], []>} : vector<8x128xf32>, vector<128x512xf32>, vector<8x512xf32> -> vector<8x512xf32>
      %142 = vector.shape_cast %139 : vector<8x512xf32> to vector<8x4x128xf32>
      %143 = tpu.transpose %142, [1, 0, 2] : vector<8x4x128xf32> -> vector<4x8x128xf32>
      %c0_71 = arith.constant 0 : index
      %144 = arith.index_cast %110 : i32 to index
      %c0_72 = arith.constant 0 : index
      %145 = vector.load %arg17[%c0_71, %144, %c0_72] : memref<4x8x128xf32, #tpu.memory_space<vmem>>, vector<4x8x128xf32>
      tpu.vector_store %arg17[%c0_71, %144, %c0_72], %143 {strides = array<i32>} : memref<4x8x128xf32, #tpu.memory_space<vmem>>, vector<4x8x128xf32>,
      %146 = vector.shape_cast %141 : vector<8x512xf32> to vector<8x4x128xf32>
      %147 = tpu.transpose %146, [1, 0, 2] : vector<8x4x128xf32> -> vector<4x8x128xf32>
      %c0_73 = arith.constant 0 : index
      %148 = arith.index_cast %110 : i32 to index
      %c0_74 = arith.constant 0 : index
      %149 = vector.load %arg18[%c0_73, %148, %c0_74] : memref<4x8x128xf32, #tpu.memory_space<vmem>>, vector<4x8x128xf32>
      tpu.vector_store %arg18[%c0_73, %148, %c0_74], %147 {strides = array<i32>} : memref<4x8x128xf32, #tpu.memory_space<vmem>>, vector<4x8x128xf32>,
      %c1_i32 = arith.constant 1 : i32
    } else {
    }
    %c8_i32 = arith.constant 8 : i32
    %8 = arith.muli %arg1, %c8_i32 : i32
    %9 = tpu.assume_multiple %8, 8 : i32
    %c0 = arith.constant 0 : index
    %10 = arith.index_cast %9 : i32 to index
    %c0_1 = arith.constant 0 : index
    %11 = vector.load %arg2[%c0, %10, %c0_1] : memref<1x8x128xf32, #tpu.memory_space<vmem>>, vector<1x8x128xf32>
    %12 = vector.shape_cast %11 : vector<1x8x128xf32> to vector<8x128xf32>
    %c0_2 = arith.constant 0 : index
    %c0_3 = arith.constant 0 : index
    %13 = vector.load %arg8[%c0_2, %c0_3] : memref<1x128xf32, #tpu.memory_space<vmem>>, vector<1x128xf32>
    %c0_4 = arith.constant 0 : index
    %c0_5 = arith.constant 0 : index
    %14 = vector.load %arg9[%c0_4, %c0_5] : memref<1x128xf32, #tpu.memory_space<vmem>>, vector<1x128xf32>
    %cst_6 = arith.constant dense<0.000000e+00> : vector<8xf32>
    %15 = vector.multi_reduction <add>, %12, %cst_6 [1] : vector<8x128xf32> to vector<8xf32>
    %16 = vector.shape_cast %15 : vector<8xf32> to vector<8x1xf32>
    %cst_7 = arith.constant 3.125000e-02 : f32
    %17 = vector.broadcast %cst_7 : f32 to vector<8x1xf32>
    %18 = arith.mulf %16, %17 : vector<8x1xf32>
    %19 = vector.broadcast %18 : vector<8x1xf32> to vector<8x128xf32>
    %20 = arith.subf %12, %19 : vector<8x128xf32>
    %21 = vector.broadcast %4 : vector<1x128xf32> to vector<8x128xf32>
    %22 = arith.mulf %20, %21 : vector<8x128xf32>
    %23 = arith.mulf %22, %22 : vector<8x128xf32>
    %cst_8 = arith.constant dense<0.000000e+00> : vector<8xf32>
    %24 = vector.multi_reduction <add>, %23, %cst_8 [1] : vector<8x128xf32> to vector<8xf32>
    %25 = vector.shape_cast %24 : vector<8xf32> to vector<8x1xf32>
    %cst_9 = arith.constant 3.125000e-02 : f32
    %26 = vector.broadcast %cst_9 : f32 to vector<8x1xf32>
    %27 = arith.mulf %25, %26 : vector<8x1xf32>
    %cst_10 = arith.constant 9.99999974E-6 : f32
    %28 = vector.broadcast %cst_10 : f32 to vector<8x1xf32>
    %29 = arith.addf %27, %28 : vector<8x1xf32>
    %30 = math.rsqrt %29 : vector<8x1xf32>
    %31 = vector.broadcast %30 : vector<8x1xf32> to vector<8x128xf32>
    %32 = arith.mulf %22, %31 : vector<8x128xf32>
    %33 = vector.broadcast %13 : vector<1x128xf32> to vector<8x128xf32>
    %34 = arith.mulf %32, %33 : vector<8x128xf32>
    %35 = vector.broadcast %14 : vector<1x128xf32> to vector<8x128xf32>
    %36 = arith.addf %34, %35 : vector<8x128xf32>
    %c0_11 = arith.constant 0 : index
    %c0_12 = arith.constant 0 : index
    %37 = vector.load %arg3[%c0_11, %c0_12] : memref<128x512xf32, #tpu.memory_space<vmem>>, vector<128x512xf32>
    %cst_13 = arith.constant dense<0.000000e+00> : vector<8x512xf32>
    %38 = tpu.matmul %36, %37, %cst_13 {dimension_numbers = #tpu.dot_dimension_numbers<[1], [0], [0], [1], [0, 0, 1, 1], [], []>} : vector<8x128xf32>, vector<128x512xf32>, vector<8x512xf32> -> vector<8x512xf32>
    %39 = vector.shape_cast %38 : vector<8x512xf32> to vector<8x4x128xf32>
    %40 = tpu.transpose %39, [1, 0, 2] : vector<8x4x128xf32> -> vector<4x8x128xf32>
    %c0_14 = arith.constant 0 : index
    %c0_15 = arith.constant 0 : index
    %c0_16 = arith.constant 0 : index
    %41 = vector.load %arg17[%c0_14, %c0_15, %c0_16] : memref<4x8x128xf32, #tpu.memory_space<vmem>>, vector<4x8x128xf32>
    "tpu.trace_start"() <{level = 10 : i32, message = "hqd,hkd->hqk"}> : () -> ()
    %cst_17 = arith.constant dense<0.000000e+00> : vector<4x8x8xf32>
    %42 = tpu.matmul %40, %41, %cst_17 {dimension_numbers = #tpu.dot_dimension_numbers<[2], [2], [1], [1], [0, 0, 0, 1, 1, 1], [0], [0]>} : vector<4x8x128xf32>, vector<4x8x128xf32>, vector<4x8x8xf32> -> vector<4x8x8xf32>
    "tpu.trace_stop"() : () -> ()
    %cst_18 = arith.constant dense<0xFF800000> : vector<4x8xf32>
    %43 = vector.multi_reduction <maximumf>, %42, %cst_18 [2] : vector<4x8x8xf32> to vector<4x8xf32>
    %44 = vector.shape_cast %43 : vector<4x8xf32> to vector<4x8x1xf32>
    %45 = vector.broadcast %44 : vector<4x8x1xf32> to vector<4x8x8xf32>
    %46 = arith.subf %42, %45 : vector<4x8x8xf32>
    %47 = math.exp %46 : vector<4x8x8xf32>
    %cst_19 = arith.constant dense<0.000000e+00> : vector<4x8xf32>
    %48 = vector.multi_reduction <add>, %47, %cst_19 [2] : vector<4x8x8xf32> to vector<4x8xf32>
    %49 = vector.shape_cast %48 : vector<4x8xf32> to vector<4x8x1xf32>
    %50 = tpu.reciprocal %49 : vector<4x8x1xf32> -> vector<4x8x1xf32>
    %51 = vector.broadcast %50 : vector<4x8x1xf32> to vector<4x8x8xf32>
    %52 = arith.mulf %47, %51 : vector<4x8x8xf32>
    %c0_20 = arith.constant 0 : index
    %c0_21 = arith.constant 0 : index
    %c0_22 = arith.constant 0 : index
    %53 = vector.load %arg18[%c0_20, %c0_21, %c0_22] : memref<4x8x128xf32, #tpu.memory_space<vmem>>, vector<4x8x128xf32>
    "tpu.trace_start"() <{level = 10 : i32, message = "hqk,hkd->hqd"}> : () -> ()
    %cst_23 = arith.constant dense<0.000000e+00> : vector<4x8x128xf32>
    %54 = tpu.matmul %52, %53, %cst_23 {dimension_numbers = #tpu.dot_dimension_numbers<[2], [1], [1], [2], [0, 0, 0, 1, 1, 2], [0], [0]>} : vector<4x8x8xf32>, vector<4x8x128xf32>, vector<4x8x128xf32> -> vector<4x8x128xf32>
    "tpu.trace_stop"() : () -> ()
    %55 = tpu.transpose %54, [1, 0, 2] : vector<4x8x128xf32> -> vector<8x4x128xf32>
    %56 = vector.shape_cast %55 : vector<8x4x128xf32> to vector<8x512xf32>
    %c0_24 = arith.constant 0 : index
    %c0_25 = arith.constant 0 : index
    %57 = vector.load %arg6[%c0_24, %c0_25] : memref<512x128xf32, #tpu.memory_space<vmem>>, vector<512x128xf32>
    %cst_26 = arith.constant dense<0.000000e+00> : vector<8x128xf32>
    %58 = tpu.matmul %56, %57, %cst_26 {dimension_numbers = #tpu.dot_dimension_numbers<[1], [0], [0], [1], [0, 0, 1, 1], [], []>} : vector<8x512xf32>, vector<512x128xf32>, vector<8x128xf32> -> vector<8x128xf32>
    %c0_27 = arith.constant 0 : index
    %c0_28 = arith.constant 0 : index
    %59 = vector.load %arg7[%c0_27, %c0_28] : memref<1x128xf32, #tpu.memory_space<vmem>>, vector<1x128xf32>
    %60 = vector.broadcast %59 : vector<1x128xf32> to vector<8x128xf32>
    %61 = arith.addf %58, %60 : vector<8x128xf32>
    %62 = arith.addf %12, %61 : vector<8x128xf32>
    %c0_29 = arith.constant 0 : index
    %c0_30 = arith.constant 0 : index
    %63 = vector.load %arg10[%c0_29, %c0_30] : memref<1x128xf32, #tpu.memory_space<vmem>>, vector<1x128xf32>
    %c0_31 = arith.constant 0 : index
    %c0_32 = arith.constant 0 : index
    %64 = vector.load %arg11[%c0_31, %c0_32] : memref<1x128xf32, #tpu.memory_space<vmem>>, vector<1x128xf32>
    %cst_33 = arith.constant dense<0.000000e+00> : vector<8xf32>
    %65 = vector.multi_reduction <add>, %62, %cst_33 [1] : vector<8x128xf32> to vector<8xf32>
    %66 = vector.shape_cast %65 : vector<8xf32> to vector<8x1xf32>
    %cst_34 = arith.constant 3.125000e-02 : f32
    %67 = vector.broadcast %cst_34 : f32 to vector<8x1xf32>
    %68 = arith.mulf %66, %67 : vector<8x1xf32>
    %69 = vector.broadcast %68 : vector<8x1xf32> to vector<8x128xf32>
    %70 = arith.subf %62, %69 : vector<8x128xf32>
    %71 = vector.broadcast %4 : vector<1x128xf32> to vector<8x128xf32>
    %72 = arith.mulf %70, %71 : vector<8x128xf32>
    %73 = arith.mulf %72, %72 : vector<8x128xf32>
    %cst_35 = arith.constant dense<0.000000e+00> : vector<8xf32>
    %74 = vector.multi_reduction <add>, %73, %cst_35 [1] : vector<8x128xf32> to vector<8xf32>
    %75 = vector.shape_cast %74 : vector<8xf32> to vector<8x1xf32>
    %cst_36 = arith.constant 3.125000e-02 : f32
    %76 = vector.broadcast %cst_36 : f32 to vector<8x1xf32>
    %77 = arith.mulf %75, %76 : vector<8x1xf32>
    %cst_37 = arith.constant 9.99999974E-6 : f32
    %78 = vector.broadcast %cst_37 : f32 to vector<8x1xf32>
    %79 = arith.addf %77, %78 : vector<8x1xf32>
    %80 = math.rsqrt %79 : vector<8x1xf32>
    %81 = vector.broadcast %80 : vector<8x1xf32> to vector<8x128xf32>
    %82 = arith.mulf %72, %81 : vector<8x128xf32>
    %83 = vector.broadcast %63 : vector<1x128xf32> to vector<8x128xf32>
    %84 = arith.mulf %82, %83 : vector<8x128xf32>
    %85 = vector.broadcast %64 : vector<1x128xf32> to vector<8x128xf32>
    %86 = arith.addf %84, %85 : vector<8x128xf32>
    %c0_38 = arith.constant 0 : index
    %c0_39 = arith.constant 0 : index
    %87 = vector.load %arg12[%c0_38, %c0_39] : memref<128x128xf32, #tpu.memory_space<vmem>>, vector<128x128xf32>
    %cst_40 = arith.constant dense<0.000000e+00> : vector<8x128xf32>
    %88 = tpu.matmul %86, %87, %cst_40 {dimension_numbers = #tpu.dot_dimension_numbers<[1], [0], [0], [1], [0, 0, 1, 1], [], []>} : vector<8x128xf32>, vector<128x128xf32>, vector<8x128xf32> -> vector<8x128xf32>
    %c0_41 = arith.constant 0 : index
    %c0_42 = arith.constant 0 : index
    %89 = vector.load %arg13[%c0_41, %c0_42] : memref<1x128xf32, #tpu.memory_space<vmem>>, vector<1x128xf32>
    %90 = vector.broadcast %89 : vector<1x128xf32> to vector<8x128xf32>
    %91 = arith.addf %88, %90 : vector<8x128xf32>
    %cst_43 = arith.constant 5.000000e-01 : f32
    %92 = vector.broadcast %cst_43 : f32 to vector<8x128xf32>
    %93 = arith.mulf %91, %92 : vector<8x128xf32>
    %cst_44 = arith.constant 0.707106769 : f32
    %94 = vector.broadcast %cst_44 : f32 to vector<8x128xf32>
    %95 = arith.mulf %91, %94 : vector<8x128xf32>
    %96 = math.erf %95 : vector<8x128xf32>
    %cst_45 = arith.constant 1.000000e+00 : f32
    %97 = vector.broadcast %cst_45 : f32 to vector<8x128xf32>
    %98 = arith.addf %97, %96 : vector<8x128xf32>
    %99 = arith.mulf %93, %98 : vector<8x128xf32>
    %c0_46 = arith.constant 0 : index
    %c0_47 = arith.constant 0 : index
    %100 = vector.load %arg14[%c0_46, %c0_47] : memref<128x128xf32, #tpu.memory_space<vmem>>, vector<128x128xf32>
    %cst_48 = arith.constant dense<0.000000e+00> : vector<8x128xf32>
    %101 = tpu.matmul %99, %100, %cst_48 {dimension_numbers = #tpu.dot_dimension_numbers<[1], [0], [0], [1], [0, 0, 1, 1], [], []>} : vector<8x128xf32>, vector<128x128xf32>, vector<8x128xf32> -> vector<8x128xf32>
    %c0_49 = arith.constant 0 : index
    %c0_50 = arith.constant 0 : index
    %102 = vector.load %arg15[%c0_49, %c0_50] : memref<1x128xf32, #tpu.memory_space<vmem>>, vector<1x128xf32>
    %103 = vector.broadcast %102 : vector<1x128xf32> to vector<8x128xf32>
    %104 = arith.addf %101, %103 : vector<8x128xf32>
    %105 = arith.addf %62, %104 : vector<8x128xf32>
    %c0_51 = arith.constant 0 : index
    %c0_52 = arith.constant 0 : index
    %c0_53 = arith.constant 0 : index
    %106 = vector.load %arg16[%c0_51, %c0_52, %c0_53] : memref<1x8x128xf32, #tpu.memory_space<vmem>>, vector<1x8x128xf32>
    %107 = vector.shape_cast %106 : vector<1x8x128xf32> to vector<8x128xf32>
    %108 = vector.shape_cast %105 : vector<8x128xf32> to vector<1x8x128xf32>
    tpu.vector_store %arg16[%c0_51, %c0_52, %c0_53], %108 {strides = array<i32>} : memref<1x8x128xf32, #tpu.memory_space<vmem>>, vector<1x8x128xf32>,
    return
  }
  func.func @transform_0(%arg0: i32, %arg1: i32) -> (i32, i32, i32) {
    %c0_i32 = arith.constant 0 : i32
    %c0_i32_0 = arith.constant 0 : i32
    %c0_i32_1 = arith.constant 0 : i32
    return %arg0, %c0_i32, %c0_i32_0 : i32, i32, i32
  }
  func.func @transform_1(%arg0: i32, %arg1: i32) -> (i32, i32) {
    %c0_i32 = arith.constant 0 : i32
    %c0_i32_0 = arith.constant 0 : i32
    %c0_i32_1 = arith.constant 0 : i32
    return %c0_i32, %c0_i32_0 : i32, i32
  }
  func.func @transform_2(%arg0: i32, %arg1: i32) -> (i32, i32) {
    %c0_i32 = arith.constant 0 : i32
    %c0_i32_0 = arith.constant 0 : i32
    %c0_i32_1 = arith.constant 0 : i32
    return %c0_i32, %c0_i32_0 : i32, i32
  }
  func.func @transform_3(%arg0: i32, %arg1: i32) -> (i32, i32) {
    %c0_i32 = arith.constant 0 : i32
    %c0_i32_0 = arith.constant 0 : i32
    %c0_i32_1 = arith.constant 0 : i32
    return %c0_i32, %c0_i32_0 : i32, i32
  }
  func.func @transform_4(%arg0: i32, %arg1: i32) -> (i32, i32) {
    %c0_i32 = arith.constant 0 : i32
    %c0_i32_0 = arith.constant 0 : i32
    %c0_i32_1 = arith.constant 0 : i32
    return %c0_i32, %c0_i32_0 : i32, i32
  }
  func.func @transform_5(%arg0: i32, %arg1: i32) -> (i32, i32) {
    %c0_i32 = arith.constant 0 : i32
    %c0_i32_0 = arith.constant 0 : i32
    %c0_i32_1 = arith.constant 0 : i32
    return %c0_i32, %c0_i32_0 : i32, i32
  }
  func.func @transform_6(%arg0: i32, %arg1: i32) -> (i32, i32) {
    %c0_i32 = arith.constant 0 : i32
    %c0_i32_0 = arith.constant 0 : i32
    %c0_i32_1 = arith.constant 0 : i32
    return %c0_i32, %c0_i32_0 : i32, i32
  }
  func.func @transform_7(%arg0: i32, %arg1: i32) -> (i32, i32) {
    %c0_i32 = arith.constant 0 : i32
    %c0_i32_0 = arith.constant 0 : i32
    %c0_i32_1 = arith.constant 0 : i32
    return %c0_i32, %c0_i32_0 : i32, i32
  }
  func.func @transform_8(%arg0: i32, %arg1: i32) -> (i32, i32) {
    %c0_i32 = arith.constant 0 : i32
    %c0_i32_0 = arith.constant 0 : i32
    %c0_i32_1 = arith.constant 0 : i32
    return %c0_i32, %c0_i32_0 : i32, i32
  }
  func.func @transform_9(%arg0: i32, %arg1: i32) -> (i32, i32) {
    %c0_i32 = arith.constant 0 : i32
    %c0_i32_0 = arith.constant 0 : i32
    %c0_i32_1 = arith.constant 0 : i32
    return %c0_i32, %c0_i32_0 : i32, i32
  }
  func.func @transform_10(%arg0: i32, %arg1: i32) -> (i32, i32) {
    %c0_i32 = arith.constant 0 : i32
    %c0_i32_0 = arith.constant 0 : i32
    %c0_i32_1 = arith.constant 0 : i32
    return %c0_i32, %c0_i32_0 : i32, i32
  }
  func.func @transform_11(%arg0: i32, %arg1: i32) -> (i32, i32) {
    %c0_i32 = arith.constant 0 : i32
    %c0_i32_0 = arith.constant 0 : i32
    %c0_i32_1 = arith.constant 0 : i32
    return %c0_i32, %c0_i32_0 : i32, i32
  }
  func.func @transform_12(%arg0: i32, %arg1: i32) -> (i32, i32) {
    %c0_i32 = arith.constant 0 : i32
    %c0_i32_0 = arith.constant 0 : i32
    %c0_i32_1 = arith.constant 0 : i32
    return %c0_i32, %c0_i32_0 : i32, i32
  }
  func.func @transform_13(%arg0: i32, %arg1: i32) -> (i32, i32) {
    %c0_i32 = arith.constant 0 : i32
    %c0_i32_0 = arith.constant 0 : i32
    %c0_i32_1 = arith.constant 0 : i32
    return %c0_i32, %c0_i32_0 : i32, i32
  }
  func.func @transform_14(%arg0: i32, %arg1: i32) -> (i32, i32, i32) {
    %c0_i32 = arith.constant 0 : i32
    %c0_i32_0 = arith.constant 0 : i32
    return %arg0, %arg1, %c0_i32 : i32, i32, i32
  }
}

</mosaic_0001>

<bundles_post_ra>
// kernel: tpu_custom_call.1
= control target key start
LH: loop header
LB: loop body
LE: loop exit
PB: predicated region body
PF: predicated region fallthrough
CT: control target
= control target key end

     0   :  { %s5331_s0 = inlined_call_operand.hbm [shape: f32[2,8,128], index: 0, kind: input, shape index: {}]   ;;  %s5332_s1 = inlined_call_operand.hbm [shape: f32[128,512], index: 1, kind: input, shape index: {}]   ;;  %s5333_s2 = inlined_call_operand.hbm [shape: f32[128,512], index: 2, kind: input, shape index: {}]   ;;  %s5334_s3 = inlined_call_operand.hbm [shape: f32[128,512], index: 3, kind: input, shape index: {}]   ;;  %s5335_s4 = inlined_call_operand.hbm [shape: f32[512,128], index: 4, kind: input, shape index: {}]   ;;  %s5336_s5 = inlined_call_operand.hbm [shape: f32[1,128], index: 5, kind: input, shape index: {}]   ;;  %s5337_s6 = inlined_call_operand.hbm [shape: f32[1,128], index: 6, kind: input, shape index: {}]   ;;  %s5338_s7 = inlined_call_operand.hbm [shape: f32[1,128], index: 7, kind: input, shape index: {}]   ;;  %s5339_s8 = inlined_call_operand.hbm [shape: f32[1,128], index: 8, kind: input, shape index: {}]   ;;  %s5340_s9 = inlined_call_operand.hbm [shape: f32[1,128], index: 9, kind: input, shape index: {}]   ;;  %s5341_s10 = inlined_call_operand.hbm [shape: f32[128,128], index: 10, kind: input, shape index: {}]   ;;  %s5342_s11 = inlined_call_operand.hbm [shape: f32[1,128], index: 11, kind: input, shape index: {}]   ;;  %s5343_s12 = inlined_call_operand.hbm [shape: f32[128,128], index: 12, kind: input, shape index: {}]   ;;  %s5344_s13 = inlined_call_operand.hbm [shape: f32[1,128], index: 13, kind: input, shape index: {}]   ;;  %s5345_s14 = inlined_call_operand.hbm [shape: f32[2,8,128], index: 14, kind: output, shape index: {}]  }
   0x1   :  { %5359 = sst [smem:[#allocation43_spill]] %s5331_s0 }
   0x2   :  { %5360 = sst [smem:[#allocation44_spill]] %s5332_s1 }
   0x3   :  { %5361 = sst [smem:[#allocation45_spill]] %s5333_s2 }
   0x4   :  { %5362 = sst [smem:[#allocation46_spill]] %s5345_s14 }
   0x5   :  { %19 = vsyncpa [#allocation5], 0 }
   0x6   :  { %21 = vsyncpa [#allocation5 + $0x1], 0 }
   0x7   :  { %22 = vsyncpa [#allocation8], 0 }
   0x8   :  { %23 = vsyncpa [#allocation11], 0 }
   0x9   :  { %24 = vsyncpa [#allocation14], 0 }
   0xa   :  { %25 = vsyncpa [#allocation17], 0 }
   0xb   :  { %26 = vsyncpa [#allocation20], 0 }
   0xc   :  { %27 = vsyncpa [#allocation23], 0 }
   0xd   :  { %28 = vsyncpa [#allocation26], 0 }
   0xe   :  { %29 = vsyncpa [#allocation6], 0 }
   0xf   :  { %31 = vsyncpa [#allocation6 + $0x1], 0  ;;  %s4616_s29 = smov 0   ;;  %s4618_s30 = smov 0  }
  0x10   :  { %s4620_s15 = smov 0   ;;  %s4622_s16 = smov 0  }
  0x11   :  { %s4624_s17 = smov 0   ;;  %s4626_s18 = smov 0  }
  0x12 LB: > { %5363 = sst [smem:[#allocation37_spill]] %s4495_s29  ;;  %s5346_s19 = sadd.s32 4294967295, %s4515_s18   ;;  %s4515_s18 = sphi %s4626_s18, %s37_s18   ;;  %s4511_s17 = sphi %s4624_s17, %s5403_s17   ;;  %s4507_s16 = sphi %s4622_s16, %s5402_s16   ;;  %s4503_s15 = sphi %s4620_s15, %s5401_s15   ;;  %s4499_s30 = sphi %s4618_s30, %s5400_s30   ;;  %s4495_s29 = sphi %s4616_s29, %s5399_s29  }
  0x13   : > { %5364 = sst [smem:[#allocation38_spill]] %s4499_s30  ;;  %p3191_p0 = scmp.ge.s32.totalorder %s4515_s18, 1 }
  0x14   : > { %5365 = sst [smem:[#allocation39_spill]] %s4503_s15  ;;  %p4650_p1 = scmp.eq.s32.totalorder %s5346_s19, 0 }
  0x15   : > { %5366 = sst [smem:[#allocation40_spill]] %s4507_s16  ;;  %p381_p2 = scmp.lt.s32.totalorder %s4515_s18, 3 }
  0x16   : > { %s5367_s20 = scalar_select %p4650_p1, 1, 0 }
  0x17   : > { %p4655_p3 = pnand %p3191_p0, %p381_p2  ;;  %s4517_s22 = smov [#allocation7]  }
  0x18   : > { %5368 = sst [smem:[#allocation41_spill]] %s5367_s20  ;;  %s393_s23 = sshll.u32 %s4517_s22, 4  ;;  %s4659_s23 = int_to_ptr.vmem [resolvable:$true] %s393_s23 }
  0x19   : > { %s5369_s21 = scalar_select %p4655_p3, 1, 0 }
  0x1a   : > { %p3840_p4 = pneg %p4655_p3  ;;  %s4518_s25 = smov [#allocation10]  }
  0x1b   : > { %5370 = sst [smem:[#allocation42_spill]] %s5369_s21  ;;  %s419_s26 = sshll.u32 %s4518_s25, 4  ;;  %s4670_s26 = int_to_ptr.vmem [resolvable:$true] %s419_s26 }
  0x1c   : > { %p4666_p6 = pnand %p3840_p4, %p4650_p1  ;;  %s4519_s27 = smov [#allocation13]  }
  0x1d   : > { %s4672_s28 = sshll.u32 %s4519_s27, 4  ;;  %s5372_s1 = sld [smem:[#allocation44_spill]]  ;;  %s447_s28 = int_to_ptr.vmem [resolvable:$true] %s4672_s28 }
  0x1e   : > { %p4682_p8 = pneg %p4666_p6 }
  0x23   : > { %s4011_s14 = scalar_lea.hbm %s5372_s1, 8192 }
  0x24   : > { %p4012_p7 = scmp.ne.s32.totalorder %s5372_s1, %s4011_s14  ;;  %p4018_p11 = scmp.lt.u32.totalorder %s4011_s14, %s5372_s1 }
  0x26   : > { %p4014_p9 = pnand %p4682_p8, %p4012_p7 }
  0x28   : > { %p4015_p10 = pneg %p4014_p9 }
  0x2a   : > { %p4020_p12 = pnand %p4018_p11, %p4015_p10 }
  0x2c   : > { %4023 = shalt.err (!%p4020_p12)
}
  0x2d   : > { %s4024_s16 = scalar_lea.vmem %s4659_s23, 8192  ;;  %p4032_p4 = scmp.lt.s32.totalorder %s4659_s23, %s4659_s23 }
  0x2e   : > { %p4025_p13 = scmp.ne.s32.totalorder %s4659_s23, %s4024_s16  ;;  %p4033_p5 = scmp.lt.s32.totalorder %s4024_s16, %s4024_s16 }
  0x30   : > { %p4027_p0 = pnand %p4025_p13, %p4682_p8  ;;  %p4034_p7 = por %p4033_p5, %p4032_p4 }
  0x32   : > { %p4028_p2 = pneg %p4027_p0 }
  0x34   : > { %p4035_p9 = pnand %p4034_p7, %p4028_p2 }
  0x36   : > { %4038 = shalt.err (!%p4035_p9)
}
  0x37   : > { %s5357_s19 = smov 512   ;;  %s4521_s14 = smov 32  }
  0x38   : > { %3843 = dma.hbm_to_vmem [thread:$0]  (!%p4666_p6), %s5372_s1, 8192, %s4659_s23, [#allocation8], %s5357_s19, %s5357_s19, %s4521_s14  }
  0x39   : > { %s4039_s16 = scalar_lea.hbm %s5334_s3, 8192 }
  0x3a   : > { %p4040_p5 = scmp.ne.s32.totalorder %s5334_s3, %s4039_s16  ;;  %p4046_p12 = scmp.lt.u32.totalorder %s4039_s16, %s5334_s3 }
  0x3c   : > { %p4042_p10 = pnand %p4040_p5, %p4682_p8 }
  0x3e   : > { %p4043_p11 = pneg %p4042_p10 }
  0x40   : > { %p4048_p13 = pnand %p4046_p12, %p4043_p11 }
  0x42   : > { %4051 = shalt.err (!%p4048_p13)
}
  0x43   : > { %s4052_s23 = scalar_lea.vmem %s4670_s26, 8192  ;;  %p4060_p7 = scmp.lt.s32.totalorder %s4670_s26, %s4670_s26 }
  0x44   : > { %p4053_p0 = scmp.ne.s32.totalorder %s4670_s26, %s4052_s23  ;;  %p4061_p9 = scmp.lt.s32.totalorder %s4052_s23, %s4052_s23 }
  0x46   : > { %p4055_p2 = pnand %p4053_p0, %p4682_p8  ;;  %p4062_p5 = por %p4061_p9, %p4060_p7 }
  0x48   : > { %p4056_p4 = pneg %p4055_p2 }
  0x4a   : > { %p4063_p10 = pnand %p4062_p5, %p4056_p4 }
  0x4c   : > { %4066 = shalt.err (!%p4063_p10)
}
  0x4d   : > { %3849 = dma.hbm_to_vmem [thread:$0]  (!%p4666_p6), %s5334_s3, 8192, %s4670_s26, [#allocation11], %s5357_s19, %s5357_s19, %s4521_s14  }
  0x4e   : > { %s4067_s21 = scalar_lea.hbm %s5336_s5, 16 }
  0x4f   : > { %p4068_p11 = scmp.ne.s32.totalorder %s5336_s5, %s4067_s21  ;;  %p4074_p0 = scmp.lt.u32.totalorder %s4067_s21, %s5336_s5 }
  0x51   : > { %p4070_p12 = pnand %p4068_p11, %p4682_p8 }
  0x53   : > { %p4071_p13 = pneg %p4070_p12 }
  0x55   : > { %p4076_p2 = pnand %p4074_p0, %p4071_p13 }
  0x57   : > { %4079 = shalt.err (!%p4076_p2)
}
  0x58   : > { %s4080_s23 = scalar_lea.vmem %s447_s28, 16  ;;  %s4087_s26 = scalar_lea.vmem %s447_s28, 32 }
  0x59   : > { %p4081_p4 = scmp.ne.s32.totalorder %s447_s28, %s4080_s23  ;;  %p4088_p5 = scmp.lt.s32.totalorder %s447_s28, %s447_s28 }
  0x5a   : > { %p4089_p10 = scmp.lt.s32.totalorder %s4087_s26, %s4080_s23 }
  0x5b   : > { %p4083_p7 = pnand %p4081_p4, %p4682_p8 }
  0x5c   : > { %p4090_p3 = por %p4089_p10, %p4088_p5 }
  0x5d   : > { %p4084_p9 = pneg %p4083_p7 }
  0x5f   : > { %p4091_p1 = pnand %p4090_p3, %p4084_p9 }
  0x61   : > { %4094 = shalt.err (!%p4091_p1)
}
  0x62   : > { %3855 = dma.hbm_to_vmem [thread:$0]  (!%p4666_p6), %s5336_s5, 16, %s447_s28, [#allocation14]  }
  0x63   : > { %s4522_s15 = smov [#allocation16]   ;;  %s4523_s21 = smov [#allocation19]  }
  0x64   : > { %s468_s20 = sshll.u32 %s4522_s15, 4  ;;  %s490_s22 = sshll.u32 %s4523_s21, 4  ;;  %s469_s20 = int_to_ptr.vmem [resolvable:$true] %s468_s20  ;;  %s491_s22 = int_to_ptr.vmem [resolvable:$true] %s490_s22 }
  0x65   : > { %s4095_s16 = scalar_lea.hbm %s5338_s7, 16 }
  0x66   : > { %p4096_p1 = scmp.ne.s32.totalorder %s5338_s7, %s4095_s16  ;;  %p4102_p12 = scmp.lt.u32.totalorder %s4095_s16, %s5338_s7 }
  0x68   : > { %p4098_p3 = pnand %p4096_p1, %p4682_p8 }
  0x6a   : > { %p4099_p11 = pneg %p4098_p3 }
  0x6c   : > { %p4104_p13 = pnand %p4102_p12, %p4099_p11 }
  0x6e   : > { %4107 = shalt.err (!%p4104_p13)
}
  0x6f   : > { %s4108_s28 = scalar_lea.vmem %s469_s20, 16  ;;  %s4115_s30 = scalar_lea.vmem %s469_s20, 32 }
  0x70   : > { %p4109_p0 = scmp.ne.s32.totalorder %s469_s20, %s4108_s28  ;;  %p4116_p7 = scmp.lt.s32.totalorder %s469_s20, %s469_s20 }
  0x71   : > { %p4117_p9 = scmp.lt.s32.totalorder %s4115_s30, %s4108_s28 }
  0x72   : > { %p4111_p2 = pnand %p4109_p0, %p4682_p8 }
  0x73   : > { %p4118_p5 = por %p4117_p9, %p4116_p7 }
  0x74   : > { %p4112_p4 = pneg %p4111_p2 }
  0x76   : > { %p4119_p10 = pnand %p4118_p5, %p4112_p4 }
  0x78   : > { %4122 = shalt.err (!%p4119_p10)
}
  0x79   : > { %3861 = dma.hbm_to_vmem [thread:$0]  (!%p4666_p6), %s5338_s7, 16, %s469_s20, [#allocation17]  }
  0x7a   : > { %s4123_s27 = scalar_lea.hbm %s5340_s9, 16 }
  0x7b   : > { %p4124_p1 = scmp.ne.s32.totalorder %s5340_s9, %s4123_s27  ;;  %p4130_p12 = scmp.lt.u32.totalorder %s4123_s27, %s5340_s9 }
  0x7d   : > { %p4126_p3 = pnand %p4124_p1, %p4682_p8 }
  0x7f   : > { %p4127_p11 = pneg %p4126_p3 }
  0x81   : > { %p4132_p13 = pnand %p4130_p12, %p4127_p11 }
  0x83   : > { %4135 = shalt.err (!%p4132_p13)
}
  0x84   : > { %s4136_s28 = scalar_lea.vmem %s491_s22, 16  ;;  %s4143_s20 = scalar_lea.vmem %s491_s22, 32 }
  0x85   : > { %p4137_p0 = scmp.ne.s32.totalorder %s491_s22, %s4136_s28  ;;  %p4144_p7 = scmp.lt.s32.totalorder %s491_s22, %s491_s22 }
  0x86   : > { %p4145_p9 = scmp.lt.s32.totalorder %s4143_s20, %s4136_s28 }
  0x87   : > { %p4139_p2 = pnand %p4137_p0, %p4682_p8 }
  0x88   : > { %p4146_p5 = por %p4145_p9, %p4144_p7 }
  0x89   : > { %p4140_p4 = pneg %p4139_p2 }
  0x8b   : > { %p4147_p10 = pnand %p4146_p5, %p4140_p4 }
  0x8d   : > { %4150 = shalt.err (!%p4147_p10)
}
  0x8e   : > { %3867 = dma.hbm_to_vmem [thread:$0]  (!%p4666_p6), %s5340_s9, 16, %s491_s22, [#allocation20]  }
  0x8f   : > { %s4524_s21 = smov [#allocation22]   ;;  %s4525_s25 = smov [#allocation9]  }
  0x90   : > { %s514_s19 = sshll.u32 %s4524_s21, 4  ;;  %s406_s27 = sshll.u32 %s4525_s25, 4  ;;  %s515_s19 = int_to_ptr.vmem [resolvable:$true] %s514_s19  ;;  %s407_s27 = int_to_ptr.vmem [resolvable:$true] %s406_s27 }
  0x91   : > { %s4151_s26 = scalar_lea.hbm %s5342_s11, 16 }
  0x92   : > { %p4152_p1 = scmp.ne.s32.totalorder %s5342_s11, %s4151_s26  ;;  %p4158_p12 = scmp.lt.u32.totalorder %s4151_s26, %s5342_s11 }
  0x94   : > { %p4154_p3 = pnand %p4152_p1, %p4682_p8 }
  0x96   : > { %p4155_p11 = pneg %p4154_p3 }
  0x98   : > { %p4160_p13 = pnand %p4158_p12, %p4155_p11 }
  0x9a   : > { %4163 = shalt.err (!%p4160_p13)
}
  0x9b   : > { %s4164_s22 = scalar_lea.vmem %s515_s19, 16  ;;  %s4171_s15 = scalar_lea.vmem %s515_s19, 32 }
  0x9c   : > { %p4165_p0 = scmp.ne.s32.totalorder %s515_s19, %s4164_s22  ;;  %p4172_p7 = scmp.lt.s32.totalorder %s515_s19, %s515_s19 }
  0x9d   : > { %p4173_p9 = scmp.lt.s32.totalorder %s4171_s15, %s4164_s22 }
  0x9e   : > { %p4167_p2 = pnand %p4165_p0, %p4682_p8 }
  0x9f   : > { %p4174_p5 = por %p4173_p9, %p4172_p7 }
  0xa0   : > { %p4168_p4 = pneg %p4167_p2 }
  0xa2   : > { %p4175_p10 = pnand %p4174_p5, %p4168_p4 }
  0xa4   : > { %4178 = shalt.err (!%p4175_p10)
}
  0xa5   : > { %3873 = dma.hbm_to_vmem [thread:$0]  (!%p4666_p6), %s5342_s11, 16, %s515_s19, [#allocation23]  }
  0xa6   : > { %s5374_s2 = sld [smem:[#allocation45_spill]] }
  0xac   : > { %s4179_s26 = scalar_lea.hbm %s5374_s2, 8192 }
  0xad   : > { %p4180_p1 = scmp.ne.s32.totalorder %s5374_s2, %s4179_s26  ;;  %p4186_p12 = scmp.lt.u32.totalorder %s4179_s26, %s5374_s2 }
  0xaf   : > { %p4182_p3 = pnand %p4180_p1, %p4682_p8 }
  0xb1   : > { %p4183_p11 = pneg %p4182_p3 }
  0xb3   : > { %p4188_p13 = pnand %p4186_p12, %p4183_p11 }
  0xb5   : > { %4191 = shalt.err (!%p4188_p13)
}
  0xb6   : > { %s4192_s22 = scalar_lea.vmem %s407_s27, 8192  ;;  %p4200_p7 = scmp.lt.s32.totalorder %s407_s27, %s407_s27 }
  0xb7   : > { %p4193_p0 = scmp.ne.s32.totalorder %s407_s27, %s4192_s22  ;;  %p4201_p9 = scmp.lt.s32.totalorder %s4192_s22, %s4192_s22 }
  0xb9   : > { %p4195_p2 = pnand %p4193_p0, %p4682_p8  ;;  %p4202_p5 = por %p4201_p9, %p4200_p7 }
  0xbb   : > { %p4196_p4 = pneg %p4195_p2 }
  0xbd   : > { %p4203_p10 = pnand %p4202_p5, %p4196_p4 }
  0xbf   : > { %4206 = shalt.err (!%p4203_p10)
}
  0xc0   : > { %s5375_s19 = smov 512   ;;  %s4526_s25 = smov [#allocation12]  }
  0xc1   : > { %3846 = dma.hbm_to_vmem [thread:$0]  (!%p4666_p6), %s5374_s2, 8192, %s407_s27, [#allocation8], %s5375_s19, %s5375_s19, %s4521_s14  }
  0xc2   : > { %s432_s16 = sshll.u32 %s4526_s25, 4  ;;  %s4207_s29 = scalar_lea.hbm %s5335_s4, 8192  ;;  %s433_s16 = int_to_ptr.vmem [resolvable:$true] %s432_s16 }
  0xc3   : > { %p4208_p1 = scmp.ne.s32.totalorder %s5335_s4, %s4207_s29  ;;  %p4214_p12 = scmp.lt.u32.totalorder %s4207_s29, %s5335_s4 }
  0xc5   : > { %p4210_p3 = pnand %p4208_p1, %p4682_p8 }
  0xc7   : > { %p4211_p11 = pneg %p4210_p3 }
  0xc9   : > { %p4216_p13 = pnand %p4214_p12, %p4211_p11 }
  0xcb   : > { %4219 = shalt.err (!%p4216_p13)
}
  0xcc   : > { %s4220_s14 = scalar_lea.vmem %s433_s16, 8192  ;;  %p4228_p7 = scmp.lt.s32.totalorder %s433_s16, %s433_s16 }
  0xcd   : > { %p4221_p0 = scmp.ne.s32.totalorder %s433_s16, %s4220_s14  ;;  %p4229_p9 = scmp.lt.s32.totalorder %s4220_s14, %s4220_s14 }
  0xcf   : > { %p4223_p2 = pnand %p4221_p0, %p4682_p8  ;;  %p4230_p5 = por %p4229_p9, %p4228_p7 }
  0xd1   : > { %p4224_p4 = pneg %p4223_p2 }
  0xd3   : > { %p4231_p10 = pnand %p4230_p5, %p4224_p4 }
  0xd5   : > { %4234 = shalt.err (!%p4231_p10)
}
  0xd6   : > { %s4527_s27 = smov 128   ;;  %s4528_s19 = smov 8  }
  0xd7   : > { %3852 = dma.hbm_to_vmem [thread:$0]  (!%p4666_p6), %s5335_s4, 8192, %s433_s16, [#allocation11], %s4527_s27, %s4527_s27, %s4528_s19  }
  0xd8   : > { %s4529_s25 = smov [#allocation15]   ;;  %s4530_s26 = smov [#allocation18]  }
  0xd9   : > { %s457_s23 = sshll.u32 %s4529_s25, 4  ;;  %s479_s29 = sshll.u32 %s4530_s26, 4  ;;  %s458_s23 = int_to_ptr.vmem [resolvable:$true] %s457_s23  ;;  %s4847_s29 = int_to_ptr.vmem [resolvable:$true] %s479_s29 }
  0xda   : > { %s4235_s30 = scalar_lea.hbm %s5337_s6, 16 }
  0xdb   : > { %p4236_p1 = scmp.ne.s32.totalorder %s5337_s6, %s4235_s30  ;;  %p4242_p12 = scmp.lt.u32.totalorder %s4235_s30, %s5337_s6 }
  0xdd   : > { %p4238_p3 = pnand %p4236_p1, %p4682_p8 }
  0xdf   : > { %p4239_p11 = pneg %p4238_p3 }
  0xe1   : > { %p4244_p13 = pnand %p4242_p12, %p4239_p11 }
  0xe3   : > { %4247 = shalt.err (!%p4244_p13)
}
  0xe4   : > { %s4248_s21 = scalar_lea.vmem %s458_s23, 16  ;;  %s4255_s25 = scalar_lea.vmem %s458_s23, 32 }
  0xe5   : > { %p4249_p0 = scmp.ne.s32.totalorder %s458_s23, %s4248_s21  ;;  %p4256_p7 = scmp.lt.s32.totalorder %s458_s23, %s458_s23 }
  0xe6   : > { %p4257_p9 = scmp.lt.s32.totalorder %s4255_s25, %s4248_s21 }
  0xe7   : > { %p4251_p2 = pnand %p4249_p0, %p4682_p8 }
  0xe8   : > { %p4258_p5 = por %p4257_p9, %p4256_p7 }
  0xe9   : > { %p4252_p4 = pneg %p4251_p2 }
  0xeb   : > { %p4259_p10 = pnand %p4258_p5, %p4252_p4 }
  0xed   : > { %4262 = shalt.err (!%p4259_p10)
}
  0xee   : > { %3858 = dma.hbm_to_vmem [thread:$0]  (!%p4666_p6), %s5337_s6, 16, %s458_s23, [#allocation14]  }
  0xef   : > { %s4263_s22 = scalar_lea.hbm %s5339_s8, 16 }
  0xf0   : > { %p4264_p1 = scmp.ne.s32.totalorder %s5339_s8, %s4263_s22  ;;  %p4270_p12 = scmp.lt.u32.totalorder %s4263_s22, %s5339_s8 }
  0xf2   : > { %p4266_p3 = pnand %p4264_p1, %p4682_p8 }
  0xf4   : > { %p4267_p11 = pneg %p4266_p3 }
  0xf6   : > { %p4272_p13 = pnand %p4270_p12, %p4267_p11 }
  0xf8   : > { %4275 = shalt.err (!%p4272_p13)
}
  0xf9   : > { %s4276_s23 = scalar_lea.vmem %s4847_s29, 16  ;;  %s4283_s25 = scalar_lea.vmem %s4847_s29, 32 }
  0xfa   : > { %p4277_p0 = scmp.ne.s32.totalorder %s4847_s29, %s4276_s23  ;;  %p4284_p7 = scmp.lt.s32.totalorder %s4847_s29, %s4847_s29 }
  0xfb   : > { %p4285_p9 = scmp.lt.s32.totalorder %s4283_s25, %s4276_s23 }
  0xfc   : > { %p4279_p2 = pnand %p4277_p0, %p4682_p8 }
  0xfd   : > { %p4286_p5 = por %p4285_p9, %p4284_p7 }
  0xfe   : > { %p4280_p4 = pneg %p4279_p2 }
 0x100   : > { %p4287_p10 = pnand %p4286_p5, %p4280_p4 }
 0x102   : > { %4290 = shalt.err (!%p4287_p10)
}
 0x103   : > { %3864 = dma.hbm_to_vmem [thread:$0]  (!%p4666_p6), %s5339_s8, 16, %s4847_s29, [#allocation17]  }
 0x104   : > { %s4531_s20 = smov [#allocation21]   ;;  %s4532_s22 = smov [#allocation24]  }
 0x105   : > { %s500_s30 = sshll.u32 %s4531_s20, 4  ;;  %s524_s14 = sshll.u32 %s4532_s22, 4  ;;  %s501_s30 = int_to_ptr.vmem [resolvable:$true] %s500_s30  ;;  %s4891_s14 = int_to_ptr.vmem [resolvable:$true] %s524_s14 }
 0x106   : > { %s4291_s21 = scalar_lea.hbm %s5341_s10, 2048 }
 0x107   : > { %p4292_p1 = scmp.ne.s32.totalorder %s5341_s10, %s4291_s21  ;;  %p4298_p12 = scmp.lt.u32.totalorder %s4291_s21, %s5341_s10 }
 0x109   : > { %p4294_p3 = pnand %p4292_p1, %p4682_p8 }
 0x10b   : > { %p4295_p11 = pneg %p4294_p3 }
 0x10d   : > { %p4300_p13 = pnand %p4298_p12, %p4295_p11 }
 0x10f   : > { %4303 = shalt.err (!%p4300_p13)
}
 0x110   : > { %s4304_s28 = scalar_lea.vmem %s501_s30, 2048  ;;  %p4312_p7 = scmp.lt.s32.totalorder %s501_s30, %s501_s30 }
 0x111   : > { %p4305_p0 = scmp.ne.s32.totalorder %s501_s30, %s4304_s28  ;;  %p4313_p9 = scmp.lt.s32.totalorder %s4304_s28, %s4304_s28 }
 0x113   : > { %p4307_p2 = pnand %p4305_p0, %p4682_p8  ;;  %p4314_p5 = por %p4313_p9, %p4312_p7 }
 0x115   : > { %p4308_p4 = pneg %p4307_p2 }
 0x117   : > { %p4315_p10 = pnand %p4314_p5, %p4308_p4 }
 0x119   : > { %4318 = shalt.err (!%p4315_p10)
}
 0x11a   : > { %3870 = dma.hbm_to_vmem [thread:$0]  (!%p4666_p6), %s5341_s10, 2048, %s501_s30, [#allocation20], %s4527_s27, %s4527_s27, %s4528_s19  }
 0x11b   : > { %s4319_s21 = scalar_lea.hbm %s5343_s12, 2048 }
 0x11c   : > { %p4320_p1 = scmp.ne.s32.totalorder %s5343_s12, %s4319_s21  ;;  %p4326_p12 = scmp.lt.u32.totalorder %s4319_s21, %s5343_s12 }
 0x11e   : > { %p4322_p3 = pnand %p4320_p1, %p4682_p8 }
 0x120   : > { %p4323_p11 = pneg %p4322_p3 }
 0x122   : > { %p4328_p13 = pnand %p4326_p12, %p4323_p11 }
 0x124   : > { %4331 = shalt.err (!%p4328_p13)
}
 0x125   : > { %s4332_s30 = scalar_lea.vmem %s4891_s14, 2048  ;;  %p4340_p7 = scmp.lt.s32.totalorder %s4891_s14, %s4891_s14 }
 0x126   : > { %p4333_p0 = scmp.ne.s32.totalorder %s4891_s14, %s4332_s30  ;;  %p4341_p9 = scmp.lt.s32.totalorder %s4332_s30, %s4332_s30 }
 0x128   : > { %p4335_p2 = pnand %p4333_p0, %p4682_p8  ;;  %p4342_p5 = por %p4341_p9, %p4340_p7 }
 0x12a   : > { %p4336_p4 = pneg %p4335_p2 }
 0x12c   : > { %p4343_p10 = pnand %p4342_p5, %p4336_p4 }
 0x12e   : > { %4346 = shalt.err (!%p4343_p10)
}
 0x12f   : > { %3876 = dma.hbm_to_vmem [thread:$0]  (!%p4666_p6), %s5343_s12, 2048, %s4891_s14, [#allocation23], %s4527_s27, %s4527_s27, %s4528_s19  }
 0x130   : > { %s4533_s22 = smov [#allocation25]   ;;  %s4347_s23 = scalar_lea.hbm %s5344_s13, 16 }
 0x131   : > { %s538_s15 = sshll.u32 %s4533_s22, 4  ;;  %p4348_p1 = scmp.ne.s32.totalorder %s5344_s13, %s4347_s23  ;;  %s539_s15 = int_to_ptr.vmem [resolvable:$true] %s538_s15 }
 0x132   : > { %p4354_p12 = scmp.lt.u32.totalorder %s4347_s23, %s5344_s13 }
 0x133   : > { %p4350_p3 = pnand %p4348_p1, %p4682_p8 }
 0x135   : > { %p4351_p11 = pneg %p4350_p3 }
 0x137   : > { %p4356_p13 = pnand %p4354_p12, %p4351_p11 }
 0x139   : > { %4359 = shalt.err (!%p4356_p13)
}
 0x13a   : > { %s4360_s27 = scalar_lea.vmem %s539_s15, 16  ;;  %s4367_s19 = scalar_lea.vmem %s539_s15, 32 }
 0x13b   : > { %p4361_p0 = scmp.ne.s32.totalorder %s539_s15, %s4360_s27  ;;  %p4368_p7 = scmp.lt.s32.totalorder %s539_s15, %s539_s15 }
 0x13c   : > { %p4369_p9 = scmp.lt.s32.totalorder %s4367_s19, %s4360_s27 }
 0x13d   : > { %p4363_p2 = pnand %p4361_p0, %p4682_p8 }
 0x13e   : > { %p4370_p5 = por %p4369_p9, %p4368_p7 }
 0x13f   : > { %p4364_p4 = pneg %p4363_p2 }
 0x141   : > { %p4371_p10 = pnand %p4370_p5, %p4364_p4 }
 0x143   : > { %4374 = shalt.err (!%p4371_p10)
}
 0x144   : > { %s5376_s20 = sld [smem:[#allocation39_spill]]  ;;  %s5377_s22 = sld [smem:[#allocation38_spill]] }
 0x145   : > { %s5378_s0 = sld [smem:[#allocation37_spill]]  ;;  %s5379_s16 = sld [smem:[#allocation41_spill]] }
 0x146   : > { %3879 = dma.hbm_to_vmem [thread:$0]  (!%p4666_p6), %s5344_s13, 16, %s539_s15, [#allocation26]  }
 0x147   : > { %s3190_s21 = sadd.s32 4294967294, %s4515_s18   ;;  %s49_s23 = sadd.s32 1, %s4511_s17 }
 0x148   : > { %p51_p8 = scmp.ge.s32.totalorder %s49_s23, 2  ;;  %p64_p3 = scmp.eq.s32.totalorder %s4515_s18, 0 }
 0x149   : > { %s5383_s29 = sadd.s32 4294967295, %s4515_s18   ;;  %p374_p4 = scmp.eq.s32.totalorder %s3190_s21, 1 }
 0x14a   : > { %s56_s24 = sadd.s32 1, %s5376_s20  ;;  %p63_p1 = scmp.ne.s32.totalorder %s5376_s20, %s5377_s22 }
 0x14b   : > { %p69_p11 = scmp.ne.s32.totalorder %s5377_s22, %s5378_s0  ;;  %s5405_s23 = smov (%p51_p8, %s49_s23), 0 }
 0x14c   : > { %p4968_p12 = por %p64_p3, %p63_p1  ;;  %p5381_p13 = scmp.ne.s32.totalorder %s5379_s16, 0 }
 0x14d   : > { %s53_s26 = ssub.s32 %s4511_s17, %s5405_s23  ;;  %p368_p0 = scmp.eq.s32.totalorder %s5383_s29, 1 }
 0x14e   : > { %p4974_p6 = por %p5381_p13, %p69_p11  ;;  %p54_p2 = scmp.eq.s32.totalorder %s53_s26, 0 }
 0x14f   : > { %p4982_p7 = por %p368_p0, %p63_p1  ;;  %p3901_p9 = scmp.lt.s32.totalorder %s4515_s18, 2 }
 0x150   : > { %s4988_s27 = scalar_select %p54_p2, %s5376_s20, %s56_s24  }
 0x151   : > { %s5384_s30 = scalar_select %p4982_p7, 1, 0 }
 0x152   : > { %p4990_p5 = por %p374_p4, %p69_p11  ;;  %s549_s14 = sand.u32 1, %s5376_s20  }
 0x153   : > { %s3206_s28 = sshll.u32 %s549_s14, 3  ;;  %s3207_s22 = sshll.u32 %s4511_s17, 7 }
 0x154   : > { %s5385_s19 = scalar_select %p4990_p5, 1, 0 }
 0x155   : > { %s5386_s1 = sld [smem:[#allocation43_spill]]  ;;  %s553_s21 = scalar_lea.vmem [#allocation4], %s3206_s28 }
 0x156   : > { %s560_s26 = sshll.u32 %s553_s21, 4  ;;  %p5005_p10 = pnand %p3901_p9, %p4968_p12  ;;  %s5001_s26 = int_to_ptr.vmem [resolvable:$true] %s560_s26 }
 0x157   : > { %s550_s20 = scalar_lea.sflag [#allocation5], %s549_s14 }
 0x158   : > { %p4377_p1 = pneg %p5005_p10 }
 0x15b   : > { %s4999_s29 = scalar_lea.hbm %s5386_s1, %s3207_s22  ;;  %s4380_s0 = scalar_lea.hbm %s5386_s1, 256 }
 0x15c   : > { %s4375_s2 = scalar_lea.hbm %s4999_s29, 128  ;;  %p4381_p12 = scmp.lt.u32.totalorder %s4999_s29, %s5386_s1 }
 0x15d   : > { %p4376_p8 = scmp.ne.s32.totalorder %s4999_s29, %s4375_s2  ;;  %p4382_p13 = scmp.lt.u32.totalorder %s4380_s0, %s4375_s2 }
 0x15e   : > { %p4384_p2 = scmp.lt.u32.totalorder %s4375_s2, %s4999_s29 }
 0x15f   : > { %p4378_p3 = pnand %p4377_p1, %p4376_p8  ;;  %p4383_p0 = por %p4382_p13, %p4381_p12 }
 0x161   : > { %p4379_p11 = pneg %p4378_p3  ;;  %p4385_p4 = por %p4384_p2, %p4383_p0 }
 0x163   : > { %p4386_p9 = pnand %p4385_p4, %p4379_p11 }
 0x165   : > { %4389 = shalt.err (!%p4386_p9)
}
 0x166   : > { %s4390_s14 = scalar_lea.vmem %s5001_s26, 128  ;;  %s4534_s21 = smov [#allocation4]  }
 0x167   : > { %p4391_p8 = scmp.ne.s32.totalorder %s5001_s26, %s4390_s14  ;;  %s4395_s28 = sshll.u32 %s4534_s21, 4  ;;  %s4396_s28 = int_to_ptr.vmem [resolvable:$false] %s4395_s28 }
 0x168   : > { %s4397_s22 = scalar_lea.vmem %s4396_s28, 256  ;;  %p4398_p7 = scmp.lt.s32.totalorder %s5001_s26, %s4396_s28 }
 0x169   : > { %p4393_p3 = pnand %p4391_p8, %p4377_p1  ;;  %p4399_p12 = scmp.lt.s32.totalorder %s4397_s22, %s4390_s14 }
 0x16b   : > { %p4394_p5 = pneg %p4393_p3  ;;  %p4400_p13 = por %p4399_p12, %p4398_p7 }
 0x16d   : > { %p4401_p0 = pnand %p4400_p13, %p4394_p5 }
 0x16f   : > { %4404 = shalt.err (!%p4401_p0)
}
 0x170   : > { %3883 = dma.hbm_to_vmem [thread:$0]  (!%p5005_p10), %s4999_s29, 128, %s5001_s26, %s550_s20  }
 0x171   : > { %s5388_s2 = sld [smem:[#allocation42_spill]] }
 0x177   : > { %p5389_p11 = scmp.ne.s32.totalorder %s5388_s2, 0 }
 0x178   : > { %s5390_s0 = sld [smem:[#allocation38_spill]] (!%p5389_p11) }
 0x179   : > { %569 = sbr.rel (%p5389_p11) target bundleno = 2773 (0xad5), region = 76 }
 0x17e   : > { %s5037_s25 = sand.u32 (!%p5389_p11), 1, %s5390_s0  }
 0x17f   : > { %s3209_s16 = sshll.u32 (!%p5389_p11), %s5037_s25, 3  ;;  %s572_s14 = scalar_lea.sflag (!%p5389_p11), [#allocation5], %s5037_s25 }
 0x180   : > { %s5043_s21 = scalar_lea.vmem [#allocation4], %s3209_s16 }
 0x181   : > { %4458 = dma.done.wait (%p4974_p6), %s572_s14, 128  }
 0x182   : > { %4460 = vsyncadd (%p4974_p6), %s572_s14, 4294967168  ;;  %s5391_s29 = sld [smem:[#allocation41_spill]] }
 0x188   : > { %p5392_p7 = scmp.ne.s32.totalorder %s5391_s29, 0 }
 0x18a   : > { %4462 = dma.done.wait (%p5392_p7), [#allocation8], 16384  }
 0x18b   : > { %4464 = vsyncadd (%p5392_p7), [#allocation8], 4294950912 }
 0x18c   : > { %4466 = dma.done.wait (%p5392_p7), [#allocation11], 16384  }
 0x18d   : > { %4468 = vsyncadd (%p5392_p7), [#allocation11], 4294950912 }
 0x18e   : > { %4470 = dma.done.wait (%p5392_p7), [#allocation14], 32  }
 0x18f   : > { %4472 = vsyncadd (%p5392_p7), [#allocation14], 4294967264 }
 0x190   : > { %4474 = dma.done.wait (%p5392_p7), [#allocation17], 32  }
 0x191   : > { %4476 = vsyncadd (%p5392_p7), [#allocation17], 4294967264 }
 0x192   : > { %4478 = dma.done.wait (%p5392_p7), [#allocation20], 2064  }
 0x193   : > { %4480 = vsyncadd (%p5392_p7), [#allocation20], 4294965232 }
 0x194   : > { %4482 = dma.done.wait (%p5392_p7), [#allocation23], 2064  }
 0x195   : > { %4484 = vsyncadd (%p5392_p7), [#allocation23], 4294965232 }
 0x196   : > { %4486 = dma.done.wait (%p5392_p7), [#allocation26], 16  }
 0x197   : > { %4488 = vsyncadd (%p5392_p7), [#allocation26], 4294967280  ;;  %v5078_v0 = vld [vmem:[%s5043_s21] sm:$0xff]  ;;  %v4535_v1 = vmov 0.0   ;;  %v711_v2 = vld [vmem:[#allocation9 + $0x8] sm:$0xff]  ;;  %v672_v38 = vlaneseq  ;;  %vm4536_vm1 = vmmov 0  }
 0x198   : > { %684 = vadd.xlane.f32.xlu0 %v5078_v0  ;;  %838 = vmatprep.mubr.f32.mxu0 %v4535_v1  ;;  %v715_v3 = vld [vmem:[#allocation9 + $0x28] sm:$0xff]  ;;  %v713_v4 = vld [vmem:[#allocation9 + $0x18] sm:$0xff]  ;;  %v710_v7 = vld [vmem:[#allocation9] sm:$0xff]  ;;  %vm2059_vm2 = vcmask 64512   ;;  %s5393_s15 = sld [smem:[#allocation40_spill]]  ;;  %s671_s24 = scalar_lea.vmem [#allocation27], %s3209_s16 }
 0x199   : > { %909 = vmatprep.mubr.f32.mxu1 %v4535_v1  ;;  %v3480_v5 = vpack.c.bf16 %v715_v3, %v711_v2  ;;  %v717_v6 = vld [vmem:[#allocation9 + $0x38] sm:$0xff]  ;;  %v714_v8 = vld [vmem:[#allocation9 + $0x20] sm:$0xff]  ;;  %v712_v11 = vld [vmem:[#allocation9 + $0x10] sm:$0xff]  ;;  %v673_v39 = vand.u32 127, %v672_v38  ;;  %s2984_s20 = sshll.u32 %s671_s24, 4  ;;  %s5394_s2 = sld [smem:[#allocation46_spill]]  ;;  %s5284_s20 = int_to_ptr.vmem [resolvable:$true] %s2984_s20 }
 0x19a   : > { %v3512_v9 = vpack.c.bf16 %v717_v6, %v713_v4  ;;  %v3482_v10 = vpack.c.bf16 %v714_v8, %v710_v7  ;;  %v716_v12 = vld [vmem:[#allocation9 + $0x30] sm:$0xff]  ;;  %v719_v13 = vld [vmem:[#allocation9 + $0x48] sm:$0xff]  ;;  %v721_v16 = vld [vmem:[#allocation9 + $0x58] sm:$0xff]  ;;  %s2970_s14 = scalar_lea.sflag [#allocation6], %s5037_s25  ;;  %p5395_p5 = scmp.ne.s32.totalorder %s5384_s30, 0 }
 0x19b   : > { %3481 = vmatprep.subr.bf16.mxu0 %v3480_v5  ;;  %v3514_v14 = vpack.c.bf16 %v716_v12, %v712_v11  ;;  %v723_v15 = vld [vmem:[#allocation9 + $0x68] sm:$0xff]  ;;  %v725_v17 = vld [vmem:[#allocation9 + $0x78] sm:$0xff]  ;;  %v718_v20 = vld [vmem:[#allocation9 + $0x40] sm:$0xff]  ;;  %vm674_vm0 = vcmp.lt.s32.totalorder %v673_v39, 32  ;;  %s4540_s16 = smov [#allocation27]  }
 0x19c   : > { %1407 = vadd.xlane.f32.xlu0 %v5078_v0  ;;  %3513 = vmatprep.subr.bf16.mxu1 %v3512_v9  ;;  %v3484_v18 = vpack.c.bf16 %v723_v15, %v719_v13  ;;  %v3516_v19 = vpack.c.bf16 %v725_v17, %v721_v16  ;;  %v722_v21 = vld [vmem:[#allocation9 + $0x60] sm:$0xff]  ;;  %v720_v22 = vld [vmem:[#allocation9 + $0x50] sm:$0xff]  ;;  %v727_v25 = vld [vmem:[#allocation9 + $0x88] sm:$0xff]  ;;  %v5086_v42 = vsel %vm674_vm0, 1.0, %v4535_v1  ;;  %s4409_s29 = sshll.u32 %s4540_s16, 4  ;;  %s4410_s29 = int_to_ptr.vmem [resolvable:$false] %s4409_s29 }
 0x19d   : > { %3483 = vmatpush1.bf16.msra.mxu0 %v3482_v10  ;;  %3515 = vmatpush1.bf16.msra.mxu1 %v3514_v14  ;;  %v3486_v23 = vpack.c.bf16 %v722_v21, %v718_v20  ;;  %v724_v24 = vld [vmem:[#allocation9 + $0x70] sm:$0xff]  ;;  %v731_v26 = vld [vmem:[#allocation9 + $0xa8] sm:$0xff]  ;;  %v729_v29 = vld [vmem:[#allocation9 + $0x98] sm:$0xff]  ;;  %p4412_p2 = scmp.lt.s32.totalorder %s5284_s20, %s4410_s29 }
 0x19e   : > { %3485 = vmatprep.subr.bf16.mxu0 %v3484_v18  ;;  %3517 = vmatprep.subr.bf16.mxu1 %v3516_v19  ;;  %v3518_v27 = vpack.c.bf16 %v724_v24, %v720_v22  ;;  %v3488_v28 = vpack.c.bf16 %v731_v26, %v727_v25  ;;  %v733_v30 = vld [vmem:[#allocation9 + $0xb8] sm:$0xff]  ;;  %v726_v31 = vld [vmem:[#allocation9 + $0x80] sm:$0xff]  ;;  %v728_v34 = vld [vmem:[#allocation9 + $0x90] sm:$0xff]  ;;  %s3247_s26 = sshll.u32 %s5393_s15, 7  ;;  %s4411_s15 = scalar_lea.vmem %s4410_s29, 256 }
 0x19f   : > { %v3520_v32 = vpack.c.bf16 %v733_v30, %v729_v29  ;;  %v730_v33 = vld [vmem:[#allocation9 + $0xa0] sm:$0xff]  ;;  %v732_v35 = vld [vmem:[#allocation9 + $0xb0] sm:$0xff]  ;;  %v735_v51 = vld [vmem:[#allocation9 + $0xc8] sm:$0xff]  ;;  %s5282_s0 = scalar_lea.hbm %s5394_s2, %s3247_s26 }
 0x1a0   : > { %v3490_v36 = vpack.c.bf16 %v730_v33, %v726_v31  ;;  %v3522_v37 = vpack.c.bf16 %v732_v35, %v728_v34  ;;  %v739_v52 = vld [vmem:[#allocation9 + $0xe8] sm:$0xff]  ;;  %v737_v53 = vld [vmem:[#allocation9 + $0xd8] sm:$0xff]  ;;  %v734_v56 = vld [vmem:[#allocation9 + $0xc0] sm:$0xff] }
 0x1a1   : > { %3487 = vmatpush1.bf16.msra.mxu0 %v3486_v23  ;;  %3519 = vmatpush1.bf16.msra.mxu1 %v3518_v27  ;;  %v3492_v54 = vpack.c.bf16 %v739_v52, %v735_v51  ;;  %v741_v55 = vld [vmem:[#allocation9 + $0xf8] sm:$0xff]  ;;  %v738_v57 = vld [vmem:[#allocation9 + $0xe0] sm:$0xff]  ;;  %v736_v60 = vld [vmem:[#allocation9 + $0xd0] sm:$0xff] }
 0x1a2   : > { %3489 = vmatprep.subr.bf16.mxu0 %v3488_v28  ;;  %3521 = vmatprep.subr.bf16.mxu1 %v3520_v32  ;;  %v3524_v58 = vpack.c.bf16 %v741_v55, %v737_v53  ;;  %v3494_v59 = vpack.c.bf16 %v738_v57, %v734_v56  ;;  %v740_v61 = vld [vmem:[#allocation9 + $0xf0] sm:$0xff]  ;;  %v743_v63 = vld [vmem:[#allocation9 + $0x108] sm:$0xff]  ;;  %v745_v2 = vld [vmem:[#allocation9 + $0x118] sm:$0xff] }
 0x1a3   : > { %v3526_v62 = vpack.c.bf16 %v740_v61, %v736_v60  ;;  %v749_v4 = vld [vmem:[#allocation9 + $0x138] sm:$0xff]  ;;  %v742_v5 = vld [vmem:[#allocation9 + $0x100] sm:$0xff]  ;;  %v744_v9 = vld [vmem:[#allocation9 + $0x110] sm:$0xff] }
 0x1a4   : > { %v746_v6 = vld [vmem:[#allocation9 + $0x120] sm:$0xff]  ;;  %v3528_v7 = vpack.c.bf16 %v749_v4, %v745_v2  ;;  %v748_v10 = vld [vmem:[#allocation9 + $0x130] sm:$0xff]  ;;  %v751_v12 = vld [vmem:[#allocation9 + $0x148] sm:$0xff] }
 0x1a5   : > { %3491 = vmatpush1.bf16.msra.mxu0 %v3490_v36  ;;  %3523 = vmatpush1.bf16.msra.mxu1 %v3522_v37  ;;  %v3498_v8 = vpack.c.bf16 %v746_v6, %v742_v5  ;;  %v3530_v11 = vpack.c.bf16 %v748_v10, %v744_v9  ;;  %v755_v13 = vld [vmem:[#allocation9 + $0x168] sm:$0xff]  ;;  %v753_v14 = vld [vmem:[#allocation9 + $0x158] sm:$0xff]  ;;  %v750_v17 = vld [vmem:[#allocation9 + $0x140] sm:$0xff] }
 0x1a6   : > { %3493 = vmatprep.subr.bf16.mxu0 %v3492_v54  ;;  %3525 = vmatprep.subr.bf16.mxu1 %v3524_v58  ;;  %v3500_v15 = vpack.c.bf16 %v755_v13, %v751_v12  ;;  %v757_v16 = vld [vmem:[#allocation9 + $0x178] sm:$0xff]  ;;  %v754_v18 = vld [vmem:[#allocation9 + $0x160] sm:$0xff]  ;;  %v752_v21 = vld [vmem:[#allocation9 + $0x150] sm:$0xff] }
 0x1a7   : > { %v3532_v19 = vpack.c.bf16 %v757_v16, %v753_v14  ;;  %v3502_v20 = vpack.c.bf16 %v754_v18, %v750_v17  ;;  %v756_v22 = vld [vmem:[#allocation9 + $0x170] sm:$0xff]  ;;  %v759_v24 = vld [vmem:[#allocation9 + $0x188] sm:$0xff]  ;;  %v761_v26 = vld [vmem:[#allocation9 + $0x198] sm:$0xff] }
 0x1a8   : > { %v3534_v23 = vpack.c.bf16 %v756_v22, %v752_v21  ;;  %v763_v25 = vld [vmem:[#allocation9 + $0x1a8] sm:$0xff]  ;;  %v765_v28 = vld [vmem:[#allocation9 + $0x1b8] sm:$0xff]  ;;  %v758_v29 = vld [vmem:[#allocation9 + $0x180] sm:$0xff] }
 0x1a9   : > { %3495 = vmatpush1.bf16.msra.mxu0 %v3494_v59  ;;  %3527 = vmatpush1.bf16.msra.mxu1 %v3526_v62  ;;  %v3504_v27 = vpack.c.bf16 %v763_v25, %v759_v24  ;;  %v762_v30 = vld [vmem:[#allocation9 + $0x1a0] sm:$0xff]  ;;  %v3536_v31 = vpack.c.bf16 %v765_v28, %v761_v26  ;;  %v760_v33 = vld [vmem:[#allocation9 + $0x190] sm:$0xff]  ;;  %v767_v35 = vld [vmem:[#allocation9 + $0x1c8] sm:$0xff] }
 0x1aa   : > { %3529 = vmatprep.subr.bf16.mxu1 %v3528_v7  ;;  %v3506_v32 = vpack.c.bf16 %v762_v30, %v758_v29  ;;  %v764_v34 = vld [vmem:[#allocation9 + $0x1b0] sm:$0xff]  ;;  %v771_v37 = vld [vmem:[#allocation9 + $0x1e8] sm:$0xff]  ;;  %v769_v39 = vld [vmem:[#allocation9 + $0x1d8] sm:$0xff] }
 0x1ab   : > { %v3538_v36 = vpack.c.bf16 %v764_v34, %v760_v33  ;;  %v917_v51 = vld [vmem:[#allocation10 + $0x8] sm:$0xff]  ;;  %v919_v55 = vld [vmem:[#allocation10 + $0x18] sm:$0xff]  ;;  %v916_v4 = vld [vmem:[#allocation10] sm:$0xff] }
 0x1ac   : > { %v921_v52 = vld [vmem:[#allocation10 + $0x28] sm:$0xff]  ;;  %v923_v56 = vld [vmem:[#allocation10 + $0x38] sm:$0xff]  ;;  %v920_v5 = vld [vmem:[#allocation10 + $0x20] sm:$0xff] }
 0x1ad   : > { %3531 = vmatpush1.bf16.msra.mxu1 %v3530_v11  ;;  %v3544_v54 = vpack.c.bf16 %v921_v52, %v917_v51  ;;  %v3576_v57 = vpack.c.bf16 %v923_v56, %v919_v55  ;;  %v918_v7 = vld [vmem:[#allocation10 + $0x10] sm:$0xff]  ;;  %v925_v9 = vld [vmem:[#allocation10 + $0x48] sm:$0xff]  ;;  %v927_v11 = vld [vmem:[#allocation10 + $0x58] sm:$0xff] }
 0x1ae   : > { %3533 = vmatprep.subr.bf16.mxu1 %v3532_v19  ;;  %v929_v10 = vld [vmem:[#allocation10 + $0x68] sm:$0xff]  ;;  %v931_v12 = vld [vmem:[#allocation10 + $0x78] sm:$0xff]  ;;  %v924_v17 = vld [vmem:[#allocation10 + $0x40] sm:$0xff] }
 0x1af   : > { %v928_v18 = vld [vmem:[#allocation10 + $0x60] sm:$0xff]  ;;  %v3580_v21 = vpack.c.bf16 %v931_v12, %v927_v11  ;;  %v926_v22 = vld [vmem:[#allocation10 + $0x50] sm:$0xff]  ;;  %v933_v24 = vld [vmem:[#allocation10 + $0x88] sm:$0xff] }
 0x1b0   : > { %v937_v25 = vld [vmem:[#allocation10 + $0xa8] sm:$0xff]  ;;  %v935_v26 = vld [vmem:[#allocation10 + $0x98] sm:$0xff]  ;;  %v3550_v29 = vpack.c.bf16 %v928_v18, %v924_v17  ;;  %v942_v51 = vld [vmem:[#allocation10 + $0xd0] sm:$0xff] }
 0x1b1   : > { %3535 = vmatpush1.bf16.msra.mxu1 %v3534_v23  ;;  %v930_v23 = vld [vmem:[#allocation10 + $0x70] sm:$0xff]  ;;  %v3552_v33 = vpack.c.bf16 %v937_v25, %v933_v24  ;;  %v951_v55 = vld [vmem:[#allocation10 + $0x118] sm:$0xff] }
 0x1b2   : > { %3537 = vmatprep.subr.bf16.mxu1 %v3536_v31  ;;  %v3582_v30 = vpack.c.bf16 %v930_v23, %v926_v22  ;;  %v932_v31 = vld [vmem:[#allocation10 + $0x80] sm:$0xff]  ;;  %v946_v52 = vld [vmem:[#allocation10 + $0xf0] sm:$0xff]  ;;  %v955_v56 = vld [vmem:[#allocation10 + $0x138] sm:$0xff] }
 0x1b3   : > { %v958_v12 = vld [vmem:[#allocation10 + $0x150] sm:$0xff]  ;;  %v971_v17 = vld [vmem:[#allocation10 + $0x1b8] sm:$0xff]  ;;  %v968_v22 = vld [vmem:[#allocation10 + $0x1a0] sm:$0xff] }
 0x1b4   : > { %v970_v25 = vld [vmem:[#allocation10 + $0x1b0] sm:$0xff] }
 0x1b5   : > { %3539 = vmatpush1.bf16.msra.mxu1 %v3538_v36  ;;  %v941_v36 = vld [vmem:[#allocation10 + $0xc8] sm:$0xff] }
 0x225   : > { %v685_v40 = vpop.xlane.xlu0 %684 }
 0x226   : > { %v686_v41 = vmul.f32 0.03125, %v685_v40  ;;  %v773_v40 = vld [vmem:[#allocation9 + $0x1f8] sm:$0xff] }
 0x228   : > { %v687_v43 = vsub.f32 %v5078_v0, %v686_v41  ;;  %v3508_v41 = vpack.c.bf16 %v771_v37, %v767_v35  ;;  %v934_v35 = vld [vmem:[#allocation10 + $0x90] sm:$0xff] }
 0x229   : > { %v1408_v44 = vpop.xlane.xlu0 %1407 }
 0x22a   : > { %v1409_v45 = vmul.f32 0.03125, %v1408_v44  ;;  %v5090_v46 = vmul.f32 %v5086_v42, %v687_v43  ;;  %v3540_v43 = vpack.c.bf16 %v773_v40, %v769_v39  ;;  %v766_v44 = vld [vmem:[#allocation9 + $0x1c0] sm:$0xff]  ;;  %v945_v39 = vld [vmem:[#allocation10 + $0xe8] sm:$0xff]  ;;  %v943_v40 = vld [vmem:[#allocation10 + $0xd8] sm:$0xff] }
 0x22c   : > { %v1410_v47 = vsub.f32 %v5078_v0, %v1409_v45  ;;  %v689_v48 = vmul.f32 %v5090_v46, %v5090_v46  ;;  %v747_v0 = vld [vmem:[#allocation9 + $0x128] sm:$0xff]  ;;  %v770_v45 = vld [vmem:[#allocation9 + $0x1e0] sm:$0xff]  ;;  %3541 = vmatprep.subr.bf16.mxu1 %v3540_v43 }
 0x22d   : > { %v3496_v3 = vpack.c.bf16 %v747_v0, %v743_v63  ;;  %v3225_v0 = vld [vmem:[#allocation15] ss:$0 sm:$0xff] }
 0x22e   : > { %690 = vadd.xlane.f32.xlu1 %v689_v48  ;;  %v5096_v49 = vmul.f32 %v5086_v42, %v1410_v47  ;;  %v768_v47 = vld [vmem:[#allocation9 + $0x1d0] sm:$0xff]  ;;  %v3510_v48 = vpack.c.bf16 %v770_v45, %v766_v44  ;;  %v940_v45 = vld [vmem:[#allocation10 + $0xc0] sm:$0xff] }
 0x22f   : > { %3497 = vmatprep.subr.bf16.mxu0 %v3496_v3  ;;  %v3226_v3 = vld [vmem:[#allocation16] ss:$0 sm:$0xff] }
 0x230   : > { %v1412_v50 = vmul.f32 %v5096_v49, %v5096_v49  ;;  %3499 = vmatpush1.bf16.msra.mxu0 %v3498_v8  ;;  %v922_v8 = vld [vmem:[#allocation10 + $0x30] sm:$0xff] }
 0x231   : > { %3501 = vmatprep.subr.bf16.mxu0 %v3500_v15  ;;  %v3546_v15 = vpack.c.bf16 %v920_v5, %v916_v4  ;;  %v3578_v16 = vpack.c.bf16 %v922_v8, %v918_v7  ;;  %v959_v4 = vld [vmem:[#allocation10 + $0x158] sm:$0xff]  ;;  %v956_v8 = vld [vmem:[#allocation10 + $0x140] sm:$0xff] }
 0x232   : > { %1413 = vadd.xlane.f32.xlu1 %v1412_v50  ;;  %v772_v50 = vld [vmem:[#allocation9 + $0x1f0] sm:$0xff]  ;;  %v963_v5 = vld [vmem:[#allocation10 + $0x178] sm:$0xff] }
 0x233   : > { %v3542_v53 = vpack.c.bf16 %v772_v50, %v768_v47  ;;  %v944_v47 = vld [vmem:[#allocation10 + $0xe0] sm:$0xff]  ;;  %v3596_v11 = vpack.c.bf16 %v963_v5, %v959_v4  ;;  %v1454_v4 = vld [vmem:[#allocation7 + $0xa8] sm:$0xff]  ;;  %v1452_v5 = vld [vmem:[#allocation7 + $0x98] sm:$0xff] }
 0x234   : > { %3503 = vmatpush1.bf16.msra.mxu0 %v3502_v20  ;;  %v3548_v20 = vpack.c.bf16 %v929_v10, %v925_v9  ;;  %v960_v9 = vld [vmem:[#allocation10 + $0x160] sm:$0xff] }
 0x235   : > { %3505 = vmatprep.subr.bf16.mxu0 %v3504_v27  ;;  %3543 = vmatpush1.bf16.msra.mxu1 %v3542_v53  ;;  %v939_v27 = vld [vmem:[#allocation10 + $0xb8] sm:$0xff]  ;;  %v949_v53 = vld [vmem:[#allocation10 + $0x108] sm:$0xff]  ;;  %v3566_v18 = vpack.c.bf16 %v960_v9, %v956_v8  ;;  %v1449_v9 = vld [vmem:[#allocation7 + $0x80] sm:$0xff] }
 0x236   : > { %3577 = vmatprep.subr.bf16.mxu1 %v3576_v57  ;;  %v3584_v34 = vpack.c.bf16 %v939_v27, %v935_v26  ;;  %v3558_v57 = vpack.c.bf16 %v944_v47, %v940_v45  ;;  %v973_v26 = vld [vmem:[#allocation10 + $0x1c8] sm:$0xff]  ;;  %v1433_v47 = vld [vmem:[#allocation7] sm:$0xff] }
 0x237   : > { %v977_v27 = vld [vmem:[#allocation10 + $0x1e8] sm:$0xff] }
 0x238   : > { %3507 = vmatpush1.bf16.msra.mxu0 %v3506_v32  ;;  %v936_v32 = vld [vmem:[#allocation10 + $0xa0] sm:$0xff] }
 0x239   : > { %3509 = vmatprep.subr.bf16.mxu0 %v3508_v41  ;;  %v947_v41 = vld [vmem:[#allocation10 + $0xf8] sm:$0xff]  ;;  %v3554_v43 = vpack.c.bf16 %v936_v32, %v932_v31  ;;  %v972_v32 = vld [vmem:[#allocation10 + $0x1c0] sm:$0xff] }
 0x23a   : > { %v3588_v50 = vpack.c.bf16 %v947_v41, %v943_v40  ;;  %v1438_v40 = vld [vmem:[#allocation7 + $0x28] sm:$0xff]  ;;  %v1436_v41 = vld [vmem:[#allocation7 + $0x18] sm:$0xff] }
 0x23c   : > { %3511 = vmatpush1.bf16.msra.mxu0 %v3510_v48  ;;  %v3556_v48 = vpack.c.bf16 %v945_v39, %v941_v36  ;;  %v978_v36 = vld [vmem:[#allocation10 + $0x1f0] sm:$0xff]  ;;  %v1434_v39 = vld [vmem:[#allocation7 + $0x8] sm:$0xff] }
 0x23d   : > { %3545 = vmatprep.subr.bf16.mxu0 %v3544_v54  ;;  %v953_v54 = vld [vmem:[#allocation10 + $0x128] sm:$0xff] }
 0x2bb   : > { %v691_v58 = vpop.xlane.xlu1 %690 }
 0x2bc   : > { %v692_v59 = vmul.f32 0.03125, %v691_v58  ;;  %v3590_v58 = vpack.c.bf16 %v946_v52, %v942_v51  ;;  %v1435_v52 = vld [vmem:[#allocation7 + $0x10] sm:$0xff] }
 0x2be   : > { %v693_v60 = vadd.f32 1e-05, %v692_v59  ;;  %v948_v59 = vld [vmem:[#allocation10 + $0x100] sm:$0xff] }
 0x2bf   : > { %v1414_v61 = vpop.xlane.xlu1 %1413 }
 0x2c0   : > { %3986 = vrsqrt.f32 %v693_v60  ;;  %v1415_v62 = vmul.f32 0.03125, %v1414_v61  ;;  %v952_v60 = vld [vmem:[#allocation10 + $0x120] sm:$0xff]  ;;  %v3560_v61 = vpack.c.bf16 %v953_v54, %v949_v53  ;;  %v1439_v53 = vld [vmem:[#allocation7 + $0x30] sm:$0xff]  ;;  %v1442_v54 = vld [vmem:[#allocation7 + $0x48] sm:$0xff] }
 0x2c2   : > { %v1416_v63 = vadd.f32 1e-05, %v1415_v62  ;;  %v3592_v62 = vpack.c.bf16 %v955_v56, %v951_v55  ;;  %v1446_v55 = vld [vmem:[#allocation7 + $0x68] sm:$0xff]  ;;  %v1444_v56 = vld [vmem:[#allocation7 + $0x58] sm:$0xff] }
 0x2c4   : > { %3988 = vrsqrt.f32 %v1416_v63  ;;  %v950_v63 = vld [vmem:[#allocation10 + $0x110] sm:$0xff] }
 0x2ca   : > { %v3987_v2 = vpop.eup %3986 }
 0x2cb   : > { %v695_v6 = vmul.f32 %v3987_v2, %v5090_v46  ;;  %v957_v2 = vld [vmem:[#allocation10 + $0x148] sm:$0xff] }
 0x2cd   : > { %v702_v13 = vmul.f32 %v3225_v0, %v695_v6  ;;  %v3562_v6 = vpack.c.bf16 %v952_v60, %v948_v59  ;;  %v3642_v59 = vpack.c.bf16 %v1439_v53, %v1435_v52  ;;  %v1441_v60 = vld [vmem:[#allocation7 + $0x40] sm:$0xff]  ;;  %v1475_v52 = vld [vmem:[#allocation7 + $0x150] sm:$0xff] }
 0x2ce   : > { %v3989_v14 = vpop.eup %3988  ;;  %v1479_v53 = vld [vmem:[#allocation7 + $0x170] sm:$0xff] }
 0x2cf   : > { %v5101_v19 = vadd.f32 %v3226_v3, %v702_v13  ;;  %v1418_v46 = vmul.f32 %v3989_v14, %v5096_v49  ;;  %v938_v49 = vld [vmem:[#allocation10 + $0xb0] sm:$0xff]  ;;  %v965_v14 = vld [vmem:[#allocation10 + $0x188] sm:$0xff] }
 0x2d0   : > { %v3586_v44 = vpack.c.bf16 %v938_v49, %v934_v35  ;;  %v962_v13 = vld [vmem:[#allocation10 + $0x170] sm:$0xff] }
 0x2d1   : > { %839 = vmatmul.mubr.f32.vlgmr.msra.gmra.mrb[0].mxu0 %v5101_v19  ;;  %910 = vmatmul.mubr.f32.vlgmr.msra.gmra.mrb[0].mxu1 %v5101_v19  ;;  %v1425_v28 = vmul.f32 %v3225_v0, %v1418_v46  ;;  %v954_v0 = vld [vmem:[#allocation10 + $0x130] sm:$0xff] }
 0x2d2   : > { %3547 = vmatpush1.bf16.msra.mxu0 %v3546_v15  ;;  %3579 = vmatpush1.bf16.msra.mxu1 %v3578_v16  ;;  %v3594_v7 = vpack.c.bf16 %v954_v0, %v950_v63  ;;  %v969_v15 = vld [vmem:[#allocation10 + $0x1a8] sm:$0xff]  ;;  %v967_v16 = vld [vmem:[#allocation10 + $0x198] sm:$0xff]  ;;  %v966_v46 = vld [vmem:[#allocation10 + $0x190] sm:$0xff] }
 0x2d3   : > { %3549 = vmatprep.subr.bf16.mxu0 %v3548_v20  ;;  %3581 = vmatprep.subr.bf16.mxu1 %v3580_v21  ;;  %v5106_v37 = vadd.f32 %v3226_v3, %v1425_v28  ;;  %v961_v3 = vld [vmem:[#allocation10 + $0x168] sm:$0xff]  ;;  %v3598_v20 = vpack.c.bf16 %v962_v13, %v958_v12  ;;  %v964_v21 = vld [vmem:[#allocation10 + $0x180] sm:$0xff]  ;;  %v3568_v23 = vpack.c.bf16 %v969_v15, %v965_v14  ;;  %v975_v28 = vld [vmem:[#allocation10 + $0x1d8] sm:$0xff] }
 0x2d4   : > { %1044 = vmatprep.mubr.f32.mxu0 %v4535_v1  ;;  %1115 = vmatprep.mubr.f32.mxu1 %v4535_v1  ;;  %v3564_v10 = vpack.c.bf16 %v961_v3, %v957_v2  ;;  %v3600_v24 = vpack.c.bf16 %v971_v17, %v967_v16  ;;  %v3602_v31 = vpack.c.bf16 %v970_v25, %v966_v46  ;;  %v974_v49 = vld [vmem:[#allocation10 + $0x1d0] sm:$0xff]  ;;  %v1450_v3 = vld [vmem:[#allocation7 + $0x88] sm:$0xff]  ;;  %v1460_v17 = vld [vmem:[#allocation7 + $0xd8] sm:$0xff] }
 0x2d5   : > { %v3606_v45 = vpack.c.bf16 %v978_v36, %v974_v49  ;;  %v1443_v0 = vld [vmem:[#allocation7 + $0x50] sm:$0xff]  ;;  %v1458_v15 = vld [vmem:[#allocation7 + $0xc8] sm:$0xff] }
 0x2d6   : > { %3551 = vmatpush1.bf16.msra.mxu0 %v3550_v29  ;;  %3583 = vmatpush1.bf16.msra.mxu1 %v3582_v30  ;;  %v979_v29 = vld [vmem:[#allocation10 + $0x1f8] sm:$0xff]  ;;  %v3570_v30 = vpack.c.bf16 %v968_v22, %v964_v21  ;;  %v1447_v2 = vld [vmem:[#allocation7 + $0x70] sm:$0xff]  ;;  %v1462_v16 = vld [vmem:[#allocation7 + $0xe8] sm:$0xff] }
 0x2d7   : > { %3553 = vmatprep.subr.bf16.mxu0 %v3552_v33  ;;  %3585 = vmatprep.subr.bf16.mxu1 %v3584_v34  ;;  %v976_v33 = vld [vmem:[#allocation10 + $0x1e0] sm:$0xff]  ;;  %v3572_v34 = vpack.c.bf16 %v977_v27, %v973_v26  ;;  %v3604_v35 = vpack.c.bf16 %v979_v29, %v975_v28  ;;  %v3646_v8 = vpack.c.bf16 %v1447_v2, %v1443_v0  ;;  %v1451_v13 = vld [vmem:[#allocation7 + $0x90] sm:$0xff]  ;;  %v1466_v26 = vld [vmem:[#allocation7 + $0x108] sm:$0xff] }
 0x2d8   : > { %v1455_v14 = vld [vmem:[#allocation7 + $0xb0] sm:$0xff]  ;;  %v1457_v21 = vld [vmem:[#allocation7 + $0xc0] sm:$0xff]  ;;  %v1470_v27 = vld [vmem:[#allocation7 + $0x128] sm:$0xff] }
 0x2d9   : > { %v1461_v22 = vld [vmem:[#allocation7 + $0xe0] sm:$0xff]  ;;  %v1459_v46 = vld [vmem:[#allocation7 + $0xd0] sm:$0xff]  ;;  %v1468_v28 = vld [vmem:[#allocation7 + $0x118] sm:$0xff] }
 0x2da   : > { %3555 = vmatpush1.bf16.msra.mxu0 %v3554_v43  ;;  %3587 = vmatpush1.bf16.msra.mxu1 %v3586_v44  ;;  %v1440_v43 = vld [vmem:[#allocation7 + $0x38] sm:$0xff]  ;;  %v3574_v44 = vpack.c.bf16 %v976_v33, %v972_v32  ;;  %v1463_v25 = vld [vmem:[#allocation7 + $0xf0] sm:$0xff]  ;;  %v1465_v32 = vld [vmem:[#allocation7 + $0x100] sm:$0xff] }
 0x2db   : > { %3557 = vmatprep.subr.bf16.mxu0 %v3556_v48  ;;  %3589 = vmatprep.subr.bf16.mxu1 %v3588_v50  ;;  %v1437_v48 = vld [vmem:[#allocation7 + $0x20] sm:$0xff]  ;;  %v3608_v50 = vpack.c.bf16 %v1438_v40, %v1434_v39  ;;  %v3640_v51 = vpack.c.bf16 %v1440_v43, %v1436_v41  ;;  %v1472_v29 = vld [vmem:[#allocation7 + $0x138] sm:$0xff]  ;;  %v1467_v49 = vld [vmem:[#allocation7 + $0x110] sm:$0xff] }
 0x2dc   : > { %v1469_v33 = vld [vmem:[#allocation7 + $0x120] sm:$0xff]  ;;  %v1471_v36 = vld [vmem:[#allocation7 + $0x130] sm:$0xff]  ;;  %v1474_v39 = vld [vmem:[#allocation7 + $0x148] sm:$0xff] }
 0x2dd   : > { %v1478_v40 = vld [vmem:[#allocation7 + $0x168] sm:$0xff]  ;;  %v1476_v41 = vld [vmem:[#allocation7 + $0x158] sm:$0xff]  ;;  %v1483_v0 = vld [vmem:[#allocation7 + $0x190] sm:$0xff] }
 0x2de   : > { %3559 = vmatpush1.bf16.msra.mxu0 %v3558_v57  ;;  %3591 = vmatpush1.bf16.msra.mxu1 %v3590_v58  ;;  %v1448_v57 = vld [vmem:[#allocation7 + $0x78] sm:$0xff]  ;;  %v3610_v58 = vpack.c.bf16 %v1437_v48, %v1433_v47  ;;  %v1473_v47 = vld [vmem:[#allocation7 + $0x140] sm:$0xff]  ;;  %v1487_v2 = vld [vmem:[#allocation7 + $0x1b0] sm:$0xff] }
 0x2df   : > { %3561 = vmatprep.subr.bf16.mxu0 %v3560_v61  ;;  %3593 = vmatprep.subr.bf16.mxu1 %v3592_v62  ;;  %v1445_v61 = vld [vmem:[#allocation7 + $0x60] sm:$0xff]  ;;  %v3612_v62 = vpack.c.bf16 %v1446_v55, %v1442_v54  ;;  %v3644_v63 = vpack.c.bf16 %v1448_v57, %v1444_v56  ;;  %v1480_v43 = vld [vmem:[#allocation7 + $0x178] sm:$0xff]  ;;  %v1482_v54 = vld [vmem:[#allocation7 + $0x188] sm:$0xff] }
 0x2e0   : > { %v1477_v48 = vld [vmem:[#allocation7 + $0x160] sm:$0xff]  ;;  %v1486_v55 = vld [vmem:[#allocation7 + $0x1a8] sm:$0xff]  ;;  %v1484_v56 = vld [vmem:[#allocation7 + $0x198] sm:$0xff] }
 0x2e1   : > { %v1488_v57 = vld [vmem:[#allocation7 + $0x1b8] sm:$0xff] }
 0x2e2   : > { %3563 = vmatpush1.bf16.msra.mxu0 %v3562_v6  ;;  %3595 = vmatpush1.bf16.msra.mxu1 %v3594_v7  ;;  %v1456_v6 = vld [vmem:[#allocation7 + $0xb8] sm:$0xff]  ;;  %v3614_v7 = vpack.c.bf16 %v1445_v61, %v1441_v60  ;;  %v1481_v60 = vld [vmem:[#allocation7 + $0x180] sm:$0xff] }
 0x2e3   : > { %3565 = vmatprep.subr.bf16.mxu0 %v3564_v10  ;;  %3597 = vmatprep.subr.bf16.mxu1 %v3596_v11  ;;  %v1453_v10 = vld [vmem:[#allocation7 + $0xa0] sm:$0xff]  ;;  %v3616_v11 = vpack.c.bf16 %v1454_v4, %v1450_v3  ;;  %v3648_v12 = vpack.c.bf16 %v1456_v6, %v1452_v5  ;;  %v1490_v3 = vld [vmem:[#allocation7 + $0x1c8] sm:$0xff]  ;;  %v1492_v5 = vld [vmem:[#allocation7 + $0x1d8] sm:$0xff] }
 0x2e4   : > { %v1485_v61 = vld [vmem:[#allocation7 + $0x1a0] sm:$0xff]  ;;  %v1494_v4 = vld [vmem:[#allocation7 + $0x1e8] sm:$0xff]  ;;  %v1496_v6 = vld [vmem:[#allocation7 + $0x1f8] sm:$0xff] }
 0x2e6   : > { %3567 = vmatpush1.bf16.msra.mxu0 %v3566_v18  ;;  %3599 = vmatpush1.bf16.msra.mxu1 %v3598_v20  ;;  %v1464_v18 = vld [vmem:[#allocation7 + $0xf8] sm:$0xff]  ;;  %v3650_v20 = vpack.c.bf16 %v1455_v14, %v1451_v13  ;;  %v1491_v13 = vld [vmem:[#allocation7 + $0x1d0] sm:$0xff] }
 0x2e7   : > { %3569 = vmatprep.subr.bf16.mxu0 %v3568_v23  ;;  %3601 = vmatprep.subr.bf16.mxu1 %v3600_v24  ;;  %v3620_v23 = vpack.c.bf16 %v1462_v16, %v1458_v15  ;;  %v3652_v24 = vpack.c.bf16 %v1464_v18, %v1460_v17  ;;  %v1495_v14 = vld [vmem:[#allocation7 + $0x1f0] sm:$0xff]  ;;  %v4537_v17 = vmov 1983009808  }
 0x2e8   : > { %v3670_v16 = vpack.c.bf16 %v1495_v14, %v1491_v13  ;;  %v1125_v18 = vunpack.c.l.s4 %v4537_v17 }
 0x2ea   : > { %3571 = vmatpush1.bf16.msra.mxu0 %v3570_v30  ;;  %3603 = vmatpush1.bf16.msra.mxu1 %v3602_v31  ;;  %v3622_v30 = vpack.c.bf16 %v1461_v22, %v1457_v21  ;;  %v3654_v31 = vpack.c.bf16 %v1463_v25, %v1459_v46  ;;  %v4538_v21 = vmov 1934713408  }
 0x2eb   : > { %3573 = vmatprep.subr.bf16.mxu0 %v3572_v34  ;;  %3605 = vmatprep.subr.bf16.mxu1 %v3604_v35  ;;  %v3624_v34 = vpack.c.bf16 %v1470_v27, %v1466_v26  ;;  %v3656_v35 = vpack.c.bf16 %v1472_v29, %v1468_v28  ;;  %v1157_v22 = vunpack.c.l.s4 %v4538_v21 }
 0x2ee   : > { %3575 = vmatpush1.bf16.msra.mxu0 %v3574_v44  ;;  %3607 = vmatpush1.bf16.msra.mxu1 %v3606_v45  ;;  %v3626_v44 = vpack.c.bf16 %v1469_v33, %v1465_v32  ;;  %v3658_v45 = vpack.c.bf16 %v1471_v36, %v1467_v49 }
 0x2ef   : > { %3609 = vmatprep.subr.bf16.mxu0 %v3608_v50  ;;  %3641 = vmatprep.subr.bf16.mxu1 %v3640_v51  ;;  %v3628_v50 = vpack.c.bf16 %v1478_v40, %v1474_v39  ;;  %v3660_v51 = vpack.c.bf16 %v1480_v43, %v1476_v41 }
 0x2f1   : > { %1045 = vmatmul.mubr.f32.vlgmr.msra.gmra.mrb[2].mxu0 %v5101_v19  ;;  %1116 = vmatmul.mubr.f32.vlgmr.msra.gmra.mrb[2].mxu1 %v5101_v19  ;;  %v3618_v19 = vpack.c.bf16 %v1453_v10, %v1449_v9  ;;  %v1489_v9 = vld [vmem:[#allocation7 + $0x1c0] sm:$0xff]  ;;  %v3636_v10 = vpack.c.bf16 %v1494_v4, %v1490_v3 }
 0x2f2   : > { %3611 = vmatpush1.bf16.msra.mxu0 %v3610_v58  ;;  %3643 = vmatpush1.bf16.msra.mxu1 %v3642_v59  ;;  %v3630_v58 = vpack.c.bf16 %v1477_v48, %v1473_v47  ;;  %v3662_v59 = vpack.c.bf16 %v1479_v53, %v1475_v52 }
 0x2f3   : > { %3613 = vmatprep.subr.bf16.mxu0 %v3612_v62  ;;  %3645 = vmatprep.subr.bf16.mxu1 %v3644_v63  ;;  %v3632_v62 = vpack.c.bf16 %v1486_v55, %v1482_v54  ;;  %v3664_v63 = vpack.c.bf16 %v1488_v57, %v1484_v56 }
 0x2f4   : > { %1561 = vmatprep.mubr.f32.mxu0 %v4535_v1  ;;  %1632 = vmatprep.mubr.f32.mxu1 %v4535_v1 }
 0x2f6   : > { %3615 = vmatpush1.bf16.msra.mxu0 %v3614_v7  ;;  %3647 = vmatpush1.bf16.msra.mxu1 %v3646_v8  ;;  %v3634_v7 = vpack.c.bf16 %v1485_v61, %v1481_v60  ;;  %v3666_v8 = vpack.c.bf16 %v1487_v2, %v1483_v0 }
 0x2f7   : > { %3617 = vmatprep.subr.bf16.mxu0 %v3616_v11  ;;  %3649 = vmatprep.subr.bf16.mxu1 %v3648_v12  ;;  %v3668_v11 = vpack.c.bf16 %v1496_v6, %v1492_v5  ;;  %v1493_v12 = vld [vmem:[#allocation7 + $0x1e0] sm:$0xff] }
 0x2f8   : > { %v3638_v15 = vpack.c.bf16 %v1493_v12, %v1489_v9 }
 0x2fa   : > { %3619 = vmatpush1.bf16.msra.mxu0 %v3618_v19  ;;  %3651 = vmatpush1.bf16.msra.mxu1 %v3650_v20  ;;  %v1126_v19 = vunpack.c.0.s8 %v1125_v18  ;;  %v1128_v20 = vshrl.u32 %v672_v38, 7 }
 0x2fb   : > { %3621 = vmatprep.subr.bf16.mxu0 %v3620_v23  ;;  %3653 = vmatprep.subr.bf16.mxu1 %v3652_v24  ;;  %v1158_v24 = vunpack.c.0.s8 %v1157_v22 }
 0x2fc   : > { %v5123_v23 = vsub.s32 %v1126_v19, %v1128_v20 }
 0x2fd   : > { %v5127_v33 = vsub.s32 %v1158_v24, %v1128_v20 }
 0x2fe   : > { %3623 = vmatpush1.bf16.msra.mxu0 %v3622_v30  ;;  %3655 = vmatpush1.bf16.msra.mxu1 %v3654_v31 }
 0x2ff   : > { %3625 = vmatprep.subr.bf16.mxu0 %v3624_v34  ;;  %3657 = vmatprep.subr.bf16.mxu1 %v3656_v35 }
 0x302   : > { %3627 = vmatpush1.bf16.msra.mxu0 %v3626_v44  ;;  %3659 = vmatpush1.bf16.msra.mxu1 %v3658_v45 }
 0x303   : > { %3629 = vmatprep.subr.bf16.mxu0 %v3628_v50  ;;  %3661 = vmatprep.subr.bf16.mxu1 %v3660_v51 }
 0x306   : > { %3631 = vmatpush1.bf16.msra.mxu0 %v3630_v58  ;;  %3663 = vmatpush1.bf16.msra.mxu1 %v3662_v59 }
 0x307   : > { %3633 = vmatprep.subr.bf16.mxu0 %v3632_v62  ;;  %3665 = vmatprep.subr.bf16.mxu1 %v3664_v63 }
 0x30a   : > { %3635 = vmatpush1.bf16.msra.mxu0 %v3634_v7  ;;  %3667 = vmatpush1.bf16.msra.mxu1 %v3666_v8 }
 0x30b   : > { %3637 = vmatprep.subr.bf16.mxu0 %v3636_v10  ;;  %3669 = vmatprep.subr.bf16.mxu1 %v3668_v11 }
 0x30e   : > { %3639 = vmatpush1.bf16.msra.mxu0 %v3638_v15  ;;  %3671 = vmatpush1.bf16.msra.mxu1 %v3670_v16 }
 0x30f   : > { %3370 = vmatprep.subr.mxu0 %v4535_v1  ;;  %3375 = vmatprep.subr.mxu1 %v4535_v1 }
 0x311   : > { %1562 = vmatmul.mubr.f32.vlgmr.msra.gmra.mrb[4].mxu0 %v5106_v37  ;;  %1633 = vmatmul.mubr.f32.vlgmr.msra.gmra.mrb[4].mxu1 %v5106_v37 }
 0x312   : > { %3372 = vmatprep.mubr.msk.f32.mxu0 %vm4536_vm1, %v4535_v1  ;;  %3377 = vmatprep.mubr.msk.f32.mxu1 %vm4536_vm1, %v4535_v1 }
 0x3a4   : > { %v840_v46 = vpop.f32.mrb[0].mxu0  ;;  %v911_v25 = vpop.f32.mrb[0].mxu1 }
 0x3a5   : > { %v1122_v37 = vcombine.low %v840_v46, %v911_v25  ;;  %v1123_v26 = vcombine.high %v840_v46, %v911_v25  ;;  %v842_v27 = vpop.f32.mrb[1].mxu0  ;;  %v913_v28 = vpop.f32.mrb[1].mxu1 }
 0x3a6   : > { %v1138_v29 = vcombine.low %v842_v27, %v913_v28  ;;  %v1139_v30 = vcombine.high %v842_v27, %v913_v28 }
 0x3a7   : > { %v1130_v31 = vrot.slane %v1122_v37, %v5123_v23  ;;  %v1137_v32 = vrot.slane %v1123_v26, %v5123_v23 }
 0x3a8   : > { %v1146_v38 = vrot.slane %v1138_v29, %v5123_v23  ;;  %v1153_v34 = vrot.slane %v1139_v30, %v5123_v23 }
 0x3aa   : > { %v1154_v35 = vcombine.low %v1130_v31, %v1146_v38  ;;  %v1155_v49 = vcombine.high %v1130_v31, %v1146_v38  ;;  %v1170_v36 = vcombine.low %v1137_v32, %v1153_v34  ;;  %v1171_v39 = vcombine.high %v1137_v32, %v1153_v34 }
 0x3ac   : > { %v1162_v40 = vrot.slane %v1154_v35, %v5127_v33  ;;  %v1169_v41 = vrot.slane %v1155_v49, %v5127_v33  ;;  %v1178_v43 = vrot.slane %v1170_v36, %v5127_v33  ;;  %v1185_v44 = vrot.slane %v1171_v39, %v5127_v33 }
 0x3ae   : > { %v1190_v45 = vcombine.low %v1162_v40, %v1169_v41  ;;  %v3227_v47 = vcombine.high %v1162_v40, %v1169_v41  ;;  %v1206_v48 = vcombine.low %v1178_v43, %v1185_v44  ;;  %v3228_v50 = vcombine.high %v1178_v43, %v1185_v44 }
 0x3b0   : > { %v1197_v51 = vrot.slane %v1190_v45, %v5123_v23  ;;  %v1205_v52 = vrot.slane %v3227_v47, %v5123_v23  ;;  %v1213_v53 = vrot.slane %v1206_v48, %v5123_v23  ;;  %v1221_v54 = vrot.slane %v3228_v50, %v5123_v23 }
 0x3b2   : > { %v1222_v55 = vcombine.low %v1197_v51, %v1205_v52  ;;  %v1238_v56 = vcombine.low %v1213_v53, %v1221_v54  ;;  %v1223_v57 = vcombine.high %v1197_v51, %v1205_v52  ;;  %v1239_v58 = vcombine.high %v1213_v53, %v1221_v54 }
 0x3b4   : > { %v1230_v59 = vrot.slane %v1222_v55, %v5127_v33  ;;  %v1246_v60 = vrot.slane %v1238_v56, %v5127_v33  ;;  %v5142_v61 = vrot.slane %v1223_v57, %v5127_v33  ;;  %v5145_v62 = vrot.slane %v1239_v58, %v5127_v33 }
 0x3b6   : > { %v1254_v63 = vcombine.low %v1230_v59, %v1246_v60  ;;  %v1255_v0 = vcombine.high %v1230_v59, %v1246_v60  ;;  %v1256_v2 = vcombine.low %v5142_v61, %v5145_v62  ;;  %v1257_v3 = vcombine.high %v5142_v61, %v5145_v62 }
 0x3b8   : > { %3371 = vmatpush3.xpose.msra.mxu0 %v1254_v63  ;;  %3376 = vmatpush3.xpose.msra.mxu1 %v1255_v0 }
 0x3b9   : > { %3380 = vmatprep.subr.mxu0 %v4535_v1  ;;  %3385 = vmatprep.subr.mxu1 %v4535_v1 }
 0x3c4   : > { %v1046_v4 = vpop.f32.mrb[2].mxu0  ;;  %v1117_v5 = vpop.f32.mrb[2].mxu1 }
 0x3c5   : > { %v1262_v6 = vcombine.low %v1046_v4, %v1117_v5  ;;  %v1263_v7 = vcombine.high %v1046_v4, %v1117_v5  ;;  %v1048_v8 = vpop.f32.mrb[3].mxu0  ;;  %v1119_v9 = vpop.f32.mrb[3].mxu1 }
 0x3c6   : > { %v1278_v10 = vcombine.low %v1048_v8, %v1119_v9  ;;  %v1279_v11 = vcombine.high %v1048_v8, %v1119_v9 }
 0x3c7   : > { %v1270_v12 = vrot.slane %v1262_v6, %v5123_v23  ;;  %v1277_v13 = vrot.slane %v1263_v7, %v5123_v23 }
 0x3c8   : > { %v1286_v14 = vrot.slane %v1278_v10, %v5123_v23  ;;  %v1293_v15 = vrot.slane %v1279_v11, %v5123_v23 }
 0x3ca   : > { %v1294_v16 = vcombine.low %v1270_v12, %v1286_v14  ;;  %v1295_v17 = vcombine.high %v1270_v12, %v1286_v14  ;;  %v1310_v18 = vcombine.low %v1277_v13, %v1293_v15  ;;  %v1311_v19 = vcombine.high %v1277_v13, %v1293_v15 }
 0x3cc   : > { %v1302_v20 = vrot.slane %v1294_v16, %v5127_v33  ;;  %v1309_v21 = vrot.slane %v1295_v17, %v5127_v33  ;;  %v1318_v22 = vrot.slane %v1310_v18, %v5127_v33  ;;  %v1325_v24 = vrot.slane %v1311_v19, %v5127_v33 }
 0x3ce   : > { %v1330_v46 = vcombine.low %v1302_v20, %v1309_v21  ;;  %v3229_v25 = vcombine.high %v1302_v20, %v1309_v21  ;;  %v1346_v37 = vcombine.low %v1318_v22, %v1325_v24  ;;  %v3230_v26 = vcombine.high %v1318_v22, %v1325_v24 }
 0x3d0   : > { %v1337_v27 = vrot.slane %v1330_v46, %v5123_v23  ;;  %v1345_v28 = vrot.slane %v3229_v25, %v5123_v23  ;;  %v1353_v29 = vrot.slane %v1346_v37, %v5123_v23  ;;  %v1361_v30 = vrot.slane %v3230_v26, %v5123_v23 }
 0x3d2   : > { %v1362_v31 = vcombine.low %v1337_v27, %v1345_v28  ;;  %v1378_v32 = vcombine.low %v1353_v29, %v1361_v30  ;;  %v1363_v38 = vcombine.high %v1337_v27, %v1345_v28  ;;  %v1379_v34 = vcombine.high %v1353_v29, %v1361_v30 }
 0x3d4   : > { %v1370_v35 = vrot.slane %v1362_v31, %v5127_v33  ;;  %v1386_v49 = vrot.slane %v1378_v32, %v5127_v33  ;;  %v5168_v36 = vrot.slane %v1363_v38, %v5127_v33  ;;  %v5171_v39 = vrot.slane %v1379_v34, %v5127_v33 }
 0x3d6   : > { %v1394_v40 = vcombine.low %v1370_v35, %v1386_v49  ;;  %v1395_v41 = vcombine.high %v1370_v35, %v1386_v49  ;;  %v1396_v43 = vcombine.low %v5168_v36, %v5171_v39  ;;  %v1397_v44 = vcombine.high %v5168_v36, %v5171_v39 }
 0x3e4   : > { %v1563_v45 = vpop.f32.mrb[4].mxu0  ;;  %v1634_v47 = vpop.f32.mrb[4].mxu1 }
 0x3e5   : > { %v1639_v48 = vcombine.low %v1563_v45, %v1634_v47  ;;  %v1640_v50 = vcombine.high %v1563_v45, %v1634_v47  ;;  %v1565_v51 = vpop.f32.mrb[5].mxu0  ;;  %v1636_v52 = vpop.f32.mrb[5].mxu1 }
 0x3e6   : > { %v1655_v53 = vcombine.low %v1565_v51, %v1636_v52  ;;  %v1656_v54 = vcombine.high %v1565_v51, %v1636_v52 }
 0x3e7   : > { %v1647_v55 = vrot.slane %v1639_v48, %v5123_v23  ;;  %v1654_v56 = vrot.slane %v1640_v50, %v5123_v23 }
 0x3e8   : > { %v1663_v57 = vrot.slane %v1655_v53, %v5123_v23  ;;  %v1670_v58 = vrot.slane %v1656_v54, %v5123_v23 }
 0x3ea   : > { %v1671_v59 = vcombine.low %v1647_v55, %v1663_v57  ;;  %v1672_v60 = vcombine.high %v1647_v55, %v1663_v57  ;;  %v1687_v63 = vcombine.low %v1654_v56, %v1670_v58  ;;  %v1688_v0 = vcombine.high %v1654_v56, %v1670_v58 }
 0x3ec   : > { %v1679_v4 = vrot.slane %v1671_v59, %v5127_v33  ;;  %v1686_v5 = vrot.slane %v1672_v60, %v5127_v33  ;;  %v1695_v6 = vrot.slane %v1687_v63, %v5127_v33  ;;  %v1702_v7 = vrot.slane %v1688_v0, %v5127_v33 }
 0x3ee   : > { %v1707_v8 = vcombine.low %v1679_v4, %v1686_v5  ;;  %v3233_v9 = vcombine.high %v1679_v4, %v1686_v5  ;;  %v1723_v10 = vcombine.low %v1695_v6, %v1702_v7  ;;  %v3234_v11 = vcombine.high %v1695_v6, %v1702_v7 }
 0x3f0   : > { %v1714_v12 = vrot.slane %v1707_v8, %v5123_v23  ;;  %v1722_v13 = vrot.slane %v3233_v9, %v5123_v23  ;;  %v1730_v14 = vrot.slane %v1723_v10, %v5123_v23  ;;  %v1738_v15 = vrot.slane %v3234_v11, %v5123_v23  ;;  %v2552_v8 = vld [vmem:[#allocation12 + $0x80] sm:$0xff]  ;;  %v2553_v9 = vld [vmem:[#allocation12 + $0x88] sm:$0xff] }
 0x3f1   : > { %v2584_v11 = vld [vmem:[#allocation12 + $0x180] sm:$0xff] }
 0x3f2   : > { %v1739_v16 = vcombine.low %v1714_v12, %v1722_v13  ;;  %v1755_v17 = vcombine.low %v1730_v14, %v1738_v15  ;;  %v1740_v18 = vcombine.high %v1714_v12, %v1722_v13  ;;  %v1756_v19 = vcombine.high %v1730_v14, %v1738_v15  ;;  %v2585_v12 = vld [vmem:[#allocation12 + $0x188] sm:$0xff]  ;;  %v2536_v15 = vld [vmem:[#allocation12] sm:$0xff] }
 0x3f4   : > { %v1747_v20 = vrot.slane %v1739_v16, %v5127_v33  ;;  %v1763_v21 = vrot.slane %v1755_v17, %v5127_v33  ;;  %v1754_v22 = vrot.slane %v1740_v18, %v5127_v33  ;;  %v1770_v24 = vrot.slane %v1756_v19, %v5127_v33  ;;  %v2568_v16 = vld [vmem:[#allocation12 + $0x100] sm:$0xff]  ;;  %v2569_v17 = vld [vmem:[#allocation12 + $0x108] sm:$0xff] }
 0x3f5   : > { %v3672_v19 = vpack.c.bf16 %v2553_v9, %v2552_v8  ;;  %v2593_v8 = vld [vmem:[#allocation12 + $0x1c8] sm:$0xff]  ;;  %v2544_v9 = vld [vmem:[#allocation12 + $0x40] sm:$0xff] }
 0x3f6   : > { %v1771_v46 = vcombine.low %v1747_v20, %v1763_v21  ;;  %v1772_v25 = vcombine.high %v1747_v20, %v1763_v21  ;;  %v1773_v37 = vcombine.low %v1754_v22, %v1770_v24  ;;  %v1774_v26 = vcombine.high %v1754_v22, %v1770_v24  ;;  %v2537_v20 = vld [vmem:[#allocation12 + $0x8] sm:$0xff]  ;;  %v2586_v21 = vld [vmem:[#allocation12 + $0x190] sm:$0xff]  ;;  %v2587_v22 = vld [vmem:[#allocation12 + $0x198] sm:$0xff] }
 0x3f7   : > { %v3704_v24 = vpack.c.bf16 %v2585_v12, %v2584_v11 }
 0x3f8   : > { %3373 = vmatmul.mubr.f32.vlgmr.msra.gmra.mrb[6].mxu0 %v1771_v46  ;;  %3378 = vmatmul.mubr.f32.vlgmr.msra.gmra.mrb[6].mxu1 %v1772_v25  ;;  %v2554_v46 = vld [vmem:[#allocation12 + $0x90] sm:$0xff]  ;;  %v2555_v25 = vld [vmem:[#allocation12 + $0x98] sm:$0xff] }
 0x3f9   : > { %3381 = vmatpush3.xpose.msra.mxu0 %v1256_v2  ;;  %3386 = vmatpush3.xpose.msra.mxu1 %v1257_v3 }
 0x3fa   : > { %3382 = vmatprep.mubr.msk.f32.mxu0 %vm4536_vm1, %v4535_v1  ;;  %3387 = vmatprep.mubr.msk.f32.mxu1 %vm4536_vm1, %v4535_v1 }
 0x3fb   : > { %3390 = vmatprep.subr.mxu0 %v4535_v1  ;;  %3395 = vmatprep.subr.mxu1 %v4535_v1 }
 0x3fc   : > { %3383 = vmatmul.mubr.f32.vlgmr.msra.gmra.mrb[8].mxu0 %v1773_v37  ;;  %3388 = vmatmul.mubr.f32.vlgmr.msra.gmra.mrb[8].mxu1 %v1774_v26  ;;  %v3706_v26 = vpack.c.bf16 %v2569_v17, %v2568_v16  ;;  %v2562_v16 = vld [vmem:[#allocation12 + $0xd0] sm:$0xff]  ;;  %v2563_v17 = vld [vmem:[#allocation12 + $0xd8] sm:$0xff] }
 0x3fd   : > { %3391 = vmatpush3.msra.mxu0 %v1394_v40  ;;  %3396 = vmatpush3.msra.mxu1 %v1395_v41 }
 0x3fe   : > { %3392 = vmatprep.mubr.msk.f32.mxu0 %vm4536_vm1, %v4535_v1  ;;  %3397 = vmatprep.mubr.msk.f32.mxu1 %vm4536_vm1, %v4535_v1 }
 0x3ff   : > { %3400 = vmatprep.subr.mxu0 %v4535_v1  ;;  %3405 = vmatprep.subr.mxu1 %v4535_v1 }
 0x4cb   : > { %v1845_v61 = vpop.f32.mrb[6].mxu0  ;;  %v1915_v62 = vpop.f32.mrb[6].mxu1 }
 0x4cc   : > { %v3374_v2 = vpop.f32.mrb[7].mxu0  ;;  %v3379_v3 = vpop.f32.mrb[7].mxu1  ;;  %v2063_v27 = vsel %vm2059_vm2, %v1915_v62, -inf  ;;  %v2060_v28 = vsel %vm2059_vm2, %v1845_v61, -inf }
 0x4cd   : > { %2064 = vmax.xlane.f32.xlu1 %v2063_v27  ;;  %2061 = vmax.xlane.f32.xlu0 %v2060_v28  ;;  %v3674_v2 = vpack.c.bf16 %v2537_v20, %v2536_v15  ;;  %v3708_v3 = vpack.c.bf16 %v2587_v22, %v2586_v21  ;;  %v2570_v27 = vld [vmem:[#allocation12 + $0x110] sm:$0xff]  ;;  %v2571_v28 = vld [vmem:[#allocation12 + $0x118] sm:$0xff] }
 0x4ce   : > { %v3710_v36 = vpack.c.bf16 %v2571_v28, %v2570_v27  ;;  %v2595_v20 = vld [vmem:[#allocation12 + $0x1d8] sm:$0xff]  ;;  %v2546_v21 = vld [vmem:[#allocation12 + $0x50] sm:$0xff]  ;;  %v2597_v27 = vld [vmem:[#allocation12 + $0x1e8] sm:$0xff] }
 0x4cf   : > { %v1985_v29 = vpop.f32.mrb[8].mxu0  ;;  %v2055_v30 = vpop.f32.mrb[8].mxu1  ;;  %v2547_v22 = vld [vmem:[#allocation12 + $0x58] sm:$0xff]  ;;  %v2548_v28 = vld [vmem:[#allocation12 + $0x60] sm:$0xff] }
 0x4d0   : > { %v3384_v31 = vpop.f32.mrb[9].mxu0  ;;  %v3389_v32 = vpop.f32.mrb[9].mxu1  ;;  %v2069_v38 = vsel %vm2059_vm2, %v2055_v30, -inf  ;;  %v2066_v34 = vsel %vm2059_vm2, %v1985_v29, -inf }
 0x4d1   : > { %2070 = vmax.xlane.f32.xlu1 %v2069_v38  ;;  %2067 = vmax.xlane.f32.xlu0 %v2066_v34  ;;  %v2539_v31 = vld [vmem:[#allocation12 + $0x18] sm:$0xff]  ;;  %v2557_v32 = vld [vmem:[#allocation12 + $0xa8] sm:$0xff]  ;;  %v2588_v38 = vld [vmem:[#allocation12 + $0x1a0] sm:$0xff] }
 0x55a   : > { %v2065_v35 = vpop.xlane.xlu1 %2064  ;;  %v2062_v49 = vpop.xlane.xlu0 %2061 }
 0x55b   : > { %v2073_v40 = vsub.f32 %v1915_v62, %v2065_v35  ;;  %v2072_v41 = vsub.f32 %v1845_v61, %v2062_v49  ;;  %v2589_v35 = vld [vmem:[#allocation12 + $0x1a8] sm:$0xff]  ;;  %v2540_v49 = vld [vmem:[#allocation12 + $0x20] sm:$0xff] }
 0x55d   : > { %v2078_v45 = vmul.f32 1.442695, %v2073_v40  ;;  %v2076_v47 = vmul.f32 1.442695, %v2072_v41  ;;  %v2541_v40 = vld [vmem:[#allocation12 + $0x28] sm:$0xff]  ;;  %v3712_v41 = vpack.c.bf16 %v2589_v35, %v2588_v38  ;;  %v2598_v38 = vld [vmem:[#allocation12 + $0x1f0] sm:$0xff] }
 0x55e   : > { %v2071_v48 = vpop.xlane.xlu1 %2070  ;;  %v2068_v50 = vpop.xlane.xlu0 %2067 }
 0x55f   : > { %3990 = vpow2.f32 %v2078_v45  ;;  %v2075_v51 = vsub.f32 %v2055_v30, %v2071_v48  ;;  %v2074_v52 = vsub.f32 %v1985_v29, %v2068_v50  ;;  %v2538_v30 = vld [vmem:[#allocation12 + $0x10] sm:$0xff]  ;;  %v3682_v45 = vpack.c.bf16 %v2541_v40, %v2540_v49  ;;  %v2573_v48 = vld [vmem:[#allocation12 + $0x128] sm:$0xff] }
 0x560   : > { %3992 = vpow2.f32 %v2076_v47  ;;  %v3678_v39 = vpack.c.bf16 %v2539_v31, %v2538_v30  ;;  %v2572_v47 = vld [vmem:[#allocation12 + $0x120] sm:$0xff]  ;;  %v2550_v40 = vld [vmem:[#allocation12 + $0x70] sm:$0xff] }
 0x561   : > { %v2082_v53 = vmul.f32 1.442695, %v2075_v51  ;;  %v2080_v54 = vmul.f32 1.442695, %v2074_v52  ;;  %v3714_v50 = vpack.c.bf16 %v2573_v48, %v2572_v47  ;;  %v2558_v51 = vld [vmem:[#allocation12 + $0xb0] sm:$0xff]  ;;  %v2559_v52 = vld [vmem:[#allocation12 + $0xb8] sm:$0xff] }
 0x562   : > { %v2580_v31 = vld [vmem:[#allocation12 + $0x160] sm:$0xff]  ;;  %v2583_v48 = vld [vmem:[#allocation12 + $0x178] sm:$0xff] }
 0x563   : > { %3994 = vpow2.f32 %v2082_v53  ;;  %v2590_v53 = vld [vmem:[#allocation12 + $0x1b0] sm:$0xff] }
 0x564   : > { %3996 = vpow2.f32 %v2080_v54  ;;  %v3684_v54 = vpack.c.bf16 %v2559_v52, %v2558_v51 }
 0x569   : > { %v3991_v55 = vpop.eup %3990 }
 0x56a   : > { %v3993_v56 = vpop.eup %3992  ;;  %v2087_v57 = vsel %vm2059_vm2, %v3991_v55, 0.0 }
 0x56b   : > { %2088 = vadd.xlane.f32.xlu1 %v2087_v57  ;;  %v2084_v58 = vsel %vm2059_vm2, %v3993_v56, 0.0  ;;  %v2543_v57 = vld [vmem:[#allocation12 + $0x38] sm:$0xff] }
 0x56c   : > { %2085 = vadd.xlane.f32.xlu0 %v2084_v58 }
 0x56d   : > { %v3995_v59 = vpop.eup %3994 }
 0x56e   : > { %v3997_v60 = vpop.eup %3996  ;;  %v2093_v63 = vsel %vm2059_vm2, %v3995_v59, 0.0 }
 0x56f   : > { %2094 = vadd.xlane.f32.xlu1 %v2093_v63  ;;  %v2090_v0 = vsel %vm2059_vm2, %v3997_v60, 0.0  ;;  %v2575_v63 = vld [vmem:[#allocation12 + $0x138] sm:$0xff] }
 0x570   : > { %2091 = vadd.xlane.f32.xlu0 %v2090_v0 }
 0x5f8   : > { %v2089_v4 = vpop.xlane.xlu1 %2088 }
 0x5f9   : > { %3998 = vrcp.f32 %v2089_v4  ;;  %v2086_v5 = vpop.xlane.xlu0 %2085  ;;  %v2560_v4 = vld [vmem:[#allocation12 + $0xc0] sm:$0xff] }
 0x5fa   : > { %4000 = vrcp.f32 %v2086_v5  ;;  %v2561_v5 = vld [vmem:[#allocation12 + $0xc8] sm:$0xff] }
 0x5fc   : > { %v2095_v6 = vpop.xlane.xlu1 %2094 }
 0x5fd   : > { %4002 = vrcp.f32 %v2095_v6  ;;  %v2092_v7 = vpop.xlane.xlu0 %2091  ;;  %v2592_v6 = vld [vmem:[#allocation12 + $0x1c0] sm:$0xff] }
 0x5fe   : > { %4004 = vrcp.f32 %v2092_v7  ;;  %v3688_v7 = vpack.c.bf16 %v2561_v5, %v2560_v4  ;;  %v3720_v11 = vpack.c.bf16 %v2593_v8, %v2592_v6 }
 0x603   : > { %v3999_v10 = vpop.eup %3998 }
 0x604   : > { %v4001_v13 = vpop.eup %4000  ;;  %v2101_v14 = vmul.f32 %v3999_v10, %v3991_v55  ;;  %v2591_v55 = vld [vmem:[#allocation12 + $0x1b8] sm:$0xff]  ;;  %v2545_v10 = vld [vmem:[#allocation12 + $0x48] sm:$0xff] }
 0x605   : > { %v2100_v18 = vmul.f32 %v4001_v13, %v3993_v56  ;;  %v2542_v56 = vld [vmem:[#allocation12 + $0x30] sm:$0xff]  ;;  %v3716_v58 = vpack.c.bf16 %v2591_v55, %v2590_v53  ;;  %v3690_v12 = vpack.c.bf16 %v2545_v10, %v2544_v9  ;;  %v2576_v13 = vld [vmem:[#allocation12 + $0x140] sm:$0xff] }
 0x606   : > { %3398 = vmatmul.mubr.msk.f32.vlgmr.msra.gmra.mrb[10].mxu1 %vm2059_vm2, %v2101_v14  ;;  %v2577_v14 = vld [vmem:[#allocation12 + $0x148] sm:$0xff] }
 0x607   : > { %v4003_v37 = vpop.eup %4002  ;;  %3393 = vmatmul.mubr.msk.f32.vlgmr.msra.gmra.mrb[10].mxu0 %vm2059_vm2, %v2100_v18  ;;  %3406 = vmatpush3.msra.mxu1 %v1397_v44  ;;  %v3676_v44 = vpack.c.bf16 %v2555_v25, %v2554_v46  ;;  %v3722_v15 = vpack.c.bf16 %v2577_v14, %v2576_v13  ;;  %v2594_v18 = vld [vmem:[#allocation12 + $0x1d0] sm:$0xff]  ;;  %v3694_v46 = vpack.c.bf16 %v2547_v22, %v2546_v21 }
 0x608   : > { %v4005_v61 = vpop.eup %4004  ;;  %v2103_v62 = vmul.f32 %v4003_v37, %v3995_v59  ;;  %3401 = vmatpush3.msra.mxu0 %v1396_v43  ;;  %3402 = vmatprep.mubr.msk.f32.mxu0 %vm4536_vm1, %v4535_v1  ;;  %v2556_v43 = vld [vmem:[#allocation12 + $0xa0] sm:$0xff]  ;;  %v3686_v59 = vpack.c.bf16 %v2543_v57, %v2542_v56  ;;  %v2578_v25 = vld [vmem:[#allocation12 + $0x150] sm:$0xff]  ;;  %v2579_v37 = vld [vmem:[#allocation12 + $0x158] sm:$0xff] }
 0x609   : > { %v2102_v29 = vmul.f32 %v4005_v61, %v3997_v60  ;;  %3407 = vmatprep.mubr.msk.f32.mxu1 %vm4536_vm1, %v4535_v1  ;;  %3673 = vmatprep.subr.bf16.mxu0 %v3672_v19  ;;  %v3680_v34 = vpack.c.bf16 %v2557_v32, %v2556_v43  ;;  %v2574_v60 = vld [vmem:[#allocation12 + $0x130] sm:$0xff]  ;;  %v3692_v19 = vpack.c.bf16 %v2563_v17, %v2562_v16  ;;  %v2564_v61 = vld [vmem:[#allocation12 + $0xe0] sm:$0xff]  ;;  %v2567_v32 = vld [vmem:[#allocation12 + $0xf8] sm:$0xff] }
 0x60a   : > { %3408 = vmatmul.mubr.msk.f32.vlgmr.msra.gmra.mrb[12].mxu1 %vm2059_vm2, %v2103_v62  ;;  %3705 = vmatprep.subr.bf16.mxu1 %v3704_v24  ;;  %v3718_v0 = vpack.c.bf16 %v2575_v63, %v2574_v60  ;;  %v3724_v24 = vpack.c.bf16 %v2595_v20, %v2594_v18  ;;  %v2565_v62 = vld [vmem:[#allocation12 + $0xe8] sm:$0xff] }
 0x60b   : > { %3403 = vmatmul.mubr.msk.f32.vlgmr.msra.gmra.mrb[12].mxu0 %vm2059_vm2, %v2102_v29  ;;  %3707 = vmatpush3.bf16.msra.mxu1 %v3706_v26  ;;  %v3726_v26 = vpack.c.bf16 %v2579_v37, %v2578_v25  ;;  %v2549_v29 = vld [vmem:[#allocation12 + $0x68] sm:$0xff] }
 0x60c   : > { %3675 = vmatpush3.bf16.msra.mxu0 %v3674_v2  ;;  %3709 = vmatprep.subr.bf16.mxu1 %v3708_v3  ;;  %v2596_v2 = vld [vmem:[#allocation12 + $0x1e0] sm:$0xff]  ;;  %v3696_v3 = vpack.c.bf16 %v2565_v62, %v2564_v61  ;;  %v3698_v30 = vpack.c.bf16 %v2549_v29, %v2548_v28 }
 0x60d   : > { %3677 = vmatprep.subr.bf16.mxu0 %v3676_v44  ;;  %v3728_v44 = vpack.c.bf16 %v2597_v27, %v2596_v2 }
 0x60f   : > { %3711 = vmatpush3.bf16.msra.mxu1 %v3710_v36  ;;  %v2581_v36 = vld [vmem:[#allocation12 + $0x168] sm:$0xff] }
 0x610   : > { %3679 = vmatpush3.bf16.msra.mxu0 %v3678_v39  ;;  %3713 = vmatprep.subr.bf16.mxu1 %v3712_v41  ;;  %v2566_v39 = vld [vmem:[#allocation12 + $0xf0] sm:$0xff]  ;;  %v3730_v43 = vpack.c.bf16 %v2581_v36, %v2580_v31  ;;  %v2551_v41 = vld [vmem:[#allocation12 + $0x78] sm:$0xff]  ;;  %v3241_v31 = vld [vmem:[#allocation13] ss:$0 sm:$0xff] }
 0x611   : > { %3681 = vmatprep.subr.bf16.mxu0 %v3680_v34  ;;  %v2599_v34 = vld [vmem:[#allocation12 + $0x1f8] sm:$0xff]  ;;  %v3700_v35 = vpack.c.bf16 %v2567_v32, %v2566_v39  ;;  %v3702_v47 = vpack.c.bf16 %v2551_v41, %v2550_v40 }
 0x612   : > { %v3732_v49 = vpack.c.bf16 %v2599_v34, %v2598_v38  ;;  %v4010_v34 = vld [vmem:[%s5043_s21] sm:$0xff]  ;;  %s4405_s21 = scalar_lea.vmem %s5284_s20, 128 }
 0x613   : > { %3715 = vmatpush3.bf16.msra.mxu1 %v3714_v50  ;;  %v2777_v40 = vld [vmem:[#allocation21 + $0x8] sm:$0xff]  ;;  %v2778_v41 = vld [vmem:[#allocation21 + $0x10] sm:$0xff]  ;;  %p4406_p6 = scmp.ne.s32.totalorder %s5284_s20, %s4405_s21  ;;  %p4413_p4 = scmp.lt.s32.totalorder %s4411_s15, %s4405_s21 }
 0x614   : > { %3683 = vmatpush3.bf16.msra.mxu0 %v3682_v45  ;;  %3717 = vmatprep.subr.bf16.mxu1 %v3716_v58  ;;  %v2582_v45 = vld [vmem:[#allocation12 + $0x170] sm:$0xff] }
 0x615   : > { %3685 = vmatprep.subr.bf16.mxu0 %v3684_v54  ;;  %v3734_v50 = vpack.c.bf16 %v2583_v48, %v2582_v45  ;;  %v4539_v45 = vmov 0.0|0.0   ;;  %p4407_p10 = pnand %p4406_p6, %p5395_p5  ;;  %p4414_p9 = por %p4413_p4, %p4412_p2 }
 0x617   : > { %3719 = vmatpush3.bf16.msra.mxu1 %v3718_v0  ;;  %p4408_p1 = pneg %p4407_p10 }
 0x618   : > { %3687 = vmatpush3.bf16.msra.mxu0 %v3686_v59  ;;  %3721 = vmatprep.subr.bf16.mxu1 %v3720_v11 }
 0x619   : > { %3689 = vmatprep.subr.bf16.mxu0 %v3688_v7  ;;  %p4415_p8 = pnand %p4414_p9, %p4408_p1 }
 0x61b   : > { %3723 = vmatpush3.bf16.msra.mxu1 %v3722_v15 }
 0x61c   : > { %3691 = vmatpush3.bf16.msra.mxu0 %v3690_v12  ;;  %3725 = vmatprep.subr.bf16.mxu1 %v3724_v24 }
 0x61d   : > { %3693 = vmatprep.subr.bf16.mxu0 %v3692_v19 }
 0x61f   : > { %3727 = vmatpush3.bf16.msra.mxu1 %v3726_v26 }
 0x620   : > { %3695 = vmatpush3.bf16.msra.mxu0 %v3694_v46  ;;  %3729 = vmatprep.subr.bf16.mxu1 %v3728_v44 }
 0x621   : > { %3697 = vmatprep.subr.bf16.mxu0 %v3696_v3 }
 0x623   : > { %3731 = vmatpush3.bf16.msra.mxu1 %v3730_v43 }
 0x624   : > { %3699 = vmatpush3.bf16.msra.mxu0 %v3698_v30  ;;  %3733 = vmatprep.subr.bf16.mxu1 %v3732_v49  ;;  %v2776_v49 = vld [vmem:[#allocation21] sm:$0xff] }
 0x625   : > { %3701 = vmatprep.subr.bf16.mxu0 %v3700_v35 }
 0x627   : > { %3735 = vmatpush3.bf16.msra.mxu1 %v3734_v50  ;;  %v2780_v50 = vld [vmem:[#allocation21 + $0x20] sm:$0xff] }
 0x628   : > { %3703 = vmatpush3.bf16.msra.mxu0 %v3702_v47  ;;  %v2779_v47 = vld [vmem:[#allocation21 + $0x18] sm:$0xff]  ;;  %3760 = vmatprep.subr.bf16.mxu1 %v4539_v45 }
 0x629   : > { %3736 = vmatprep.subr.bf16.mxu0 %v4539_v45  ;;  %v3740_v48 = vpack.c.bf16 %v2779_v47, %v2778_v41 }
 0x6d9   : > { %v2250_v51 = vpop.f32.mrb[10].mxu1 }
 0x6da   : > { %v2177_v52 = vpop.f32.mrb[10].mxu0  ;;  %v3399_v53 = vpop.f32.mrb[11].mxu1 }
 0x6db   : > { %v3394_v54 = vpop.f32.mrb[11].mxu0 }
 0x6dd   : > { %v2396_v55 = vpop.f32.mrb[12].mxu1 }
 0x6de   : > { %v2323_v56 = vpop.f32.mrb[12].mxu0  ;;  %v2416_v57 = vcombine.low %v2250_v51, %v2396_v55  ;;  %v2417_v58 = vcombine.high %v2250_v51, %v2396_v55  ;;  %v3409_v59 = vpop.f32.mrb[13].mxu1  ;;  %v2781_v51 = vld [vmem:[#allocation21 + $0x28] sm:$0xff] }
 0x6df   : > { %v2400_v60 = vcombine.low %v2177_v52, %v2323_v56  ;;  %v2401_v63 = vcombine.high %v2177_v52, %v2323_v56  ;;  %v3404_v0 = vpop.f32.mrb[13].mxu0  ;;  %v3743_v52 = vpack.c.bf16 %v2781_v51, %v2780_v50  ;;  %v2783_v59 = vld [vmem:[#allocation21 + $0x38] sm:$0xff] }
 0x6e0   : > { %v2424_v4 = vrot.slane %v2416_v57, %v5123_v23  ;;  %v2431_v5 = vrot.slane %v2417_v58, %v5123_v23  ;;  %v2782_v58 = vld [vmem:[#allocation21 + $0x30] sm:$0xff]  ;;  %v2785_v0 = vld [vmem:[#allocation21 + $0x48] sm:$0xff] }
 0x6e1   : > { %v2408_v6 = vrot.slane %v2400_v60, %v5123_v23  ;;  %v2415_v7 = vrot.slane %v2401_v63, %v5123_v23  ;;  %v3746_v60 = vpack.c.bf16 %v2783_v59, %v2782_v58  ;;  %v2784_v63 = vld [vmem:[#allocation21 + $0x40] sm:$0xff] }
 0x6e3   : > { %v2432_v8 = vcombine.low %v2408_v6, %v2424_v4  ;;  %v2433_v9 = vcombine.high %v2408_v6, %v2424_v4  ;;  %v2448_v10 = vcombine.low %v2415_v7, %v2431_v5  ;;  %v2449_v11 = vcombine.high %v2415_v7, %v2431_v5  ;;  %v2786_v4 = vld [vmem:[#allocation21 + $0x50] sm:$0xff]  ;;  %v2787_v6 = vld [vmem:[#allocation21 + $0x58] sm:$0xff] }
 0x6e4   : > { %v3749_v5 = vpack.c.bf16 %v2785_v0, %v2784_v63  ;;  %v3752_v7 = vpack.c.bf16 %v2787_v6, %v2786_v4 }
 0x6e5   : > { %v2440_v12 = vrot.slane %v2432_v8, %v5127_v33  ;;  %v2447_v13 = vrot.slane %v2433_v9, %v5127_v33  ;;  %v2456_v14 = vrot.slane %v2448_v10, %v5127_v33  ;;  %v2463_v15 = vrot.slane %v2449_v11, %v5127_v33  ;;  %v2788_v8 = vld [vmem:[#allocation21 + $0x60] sm:$0xff]  ;;  %v2789_v9 = vld [vmem:[#allocation21 + $0x68] sm:$0xff]  ;;  %v2790_v10 = vld [vmem:[#allocation21 + $0x70] sm:$0xff] }
 0x6e6   : > { %v2791_v11 = vld [vmem:[#allocation21 + $0x78] sm:$0xff] }
 0x6e7   : > { %v2468_v16 = vcombine.low %v2440_v12, %v2447_v13  ;;  %v3239_v17 = vcombine.high %v2440_v12, %v2447_v13  ;;  %v2484_v18 = vcombine.low %v2456_v14, %v2463_v15  ;;  %v3240_v19 = vcombine.high %v2456_v14, %v2463_v15  ;;  %v2874_v13 = vld [vmem:[#allocation24] sm:$0xff]  ;;  %v2875_v14 = vld [vmem:[#allocation24 + $0x8] sm:$0xff]  ;;  %v2876_v15 = vld [vmem:[#allocation24 + $0x10] sm:$0xff] }
 0x6e8   : > { %v3758_v12 = vpack.c.bf16 %v2791_v11, %v2790_v10 }
 0x6e9   : > { %v2475_v20 = vrot.slane %v2468_v16, %v5123_v23  ;;  %v2483_v21 = vrot.slane %v3239_v17, %v5123_v23  ;;  %v2491_v22 = vrot.slane %v2484_v18, %v5123_v23  ;;  %v2499_v24 = vrot.slane %v3240_v19, %v5123_v23  ;;  %v2877_v17 = vld [vmem:[#allocation24 + $0x18] sm:$0xff]  ;;  %v2878_v19 = vld [vmem:[#allocation24 + $0x20] sm:$0xff] }
 0x6ea   : > { %v3761_v16 = vpack.c.bf16 %v2875_v14, %v2874_v13  ;;  %v3764_v18 = vpack.c.bf16 %v2877_v17, %v2876_v15 }
 0x6eb   : > { %v2500_v46 = vcombine.low %v2475_v20, %v2483_v21  ;;  %v2516_v25 = vcombine.low %v2491_v22, %v2499_v24  ;;  %v2501_v37 = vcombine.high %v2475_v20, %v2483_v21  ;;  %v2517_v26 = vcombine.high %v2491_v22, %v2499_v24  ;;  %v2879_v20 = vld [vmem:[#allocation24 + $0x28] sm:$0xff] }
 0x6ec   : > { %v3767_v21 = vpack.c.bf16 %v2879_v20, %v2878_v19 }
 0x6ed   : > { %v2508_v61 = vrot.slane %v2500_v46, %v5127_v33  ;;  %v2524_v62 = vrot.slane %v2516_v25, %v5127_v33  ;;  %v2515_v2 = vrot.slane %v2501_v37, %v5127_v33  ;;  %v2531_v3 = vrot.slane %v2517_v26, %v5127_v33  ;;  %v3242_v37 = vld [vmem:[#allocation18] ss:$0 sm:$0xff] }
 0x6ef   : > { %v2533_v27 = vcombine.high %v2508_v61, %v2524_v62  ;;  %v2535_v28 = vcombine.high %v2515_v2, %v2531_v3  ;;  %v2532_v29 = vcombine.low %v2508_v61, %v2524_v62  ;;  %v2534_v44 = vcombine.low %v2515_v2, %v2531_v3  ;;  %v3243_v61 = vld [vmem:[#allocation19] ss:$0 sm:$0xff]  ;;  %v2880_v3 = vld [vmem:[#allocation24 + $0x30] sm:$0xff] }
 0x6f1   : > { %2671 = vmatprep.mubr.f32.mxu0 %v2533_v27  ;;  %2741 = vmatprep.mubr.f32.mxu1 %v2535_v28  ;;  %v2881_v27 = vld [vmem:[#allocation24 + $0x38] sm:$0xff] }
 0x6f2   : > { %2672 = vmatmul.mubr.f32.vlgmr.msra.gmra.mrb[14].mxu0 %v2532_v29  ;;  %2742 = vmatmul.mubr.f32.vlgmr.msra.gmra.mrb[14].mxu1 %v2534_v44  ;;  %v3770_v28 = vpack.c.bf16 %v2881_v27, %v2880_v3  ;;  %v2882_v29 = vld [vmem:[#allocation24 + $0x40] sm:$0xff]  ;;  %v2883_v44 = vld [vmem:[#allocation24 + $0x48] sm:$0xff] }
 0x6f3   : > { %3442 = vmatprep.mubr.msk.f32.mxu0 %vm4536_vm1, %v4535_v1  ;;  %3477 = vmatprep.mubr.msk.f32.mxu1 %vm4536_vm1, %v4535_v1  ;;  %v3737_v1 = vpack.c.bf16 %v2777_v40, %v2776_v49  ;;  %v3244_v49 = vld [vmem:[#allocation22] ss:$0 sm:$0xff] }
 0x6f4   : > { %3762 = vmatpush3.bf16.msra.mxu1 %v3761_v16 }
 0x6f5   : > { %3738 = vmatpush3.bf16.msra.mxu0 %v3737_v1  ;;  %3763 = vmatprep.subr.bf16.mxu1 %v4539_v45 }
 0x6f6   : > { %3739 = vmatprep.subr.bf16.mxu0 %v4539_v45 }
 0x6f8   : > { %3765 = vmatpush3.bf16.msra.mxu1 %v3764_v18 }
 0x6f9   : > { %3741 = vmatpush3.bf16.msra.mxu0 %v3740_v48  ;;  %3766 = vmatprep.subr.bf16.mxu1 %v4539_v45 }
 0x6fa   : > { %3742 = vmatprep.subr.bf16.mxu0 %v4539_v45 }
 0x6fc   : > { %3768 = vmatpush3.bf16.msra.mxu1 %v3767_v21 }
 0x6fd   : > { %3744 = vmatpush3.bf16.msra.mxu0 %v3743_v52  ;;  %3769 = vmatprep.subr.bf16.mxu1 %v4539_v45 }
 0x6fe   : > { %3745 = vmatprep.subr.bf16.mxu0 %v4539_v45 }
 0x700   : > { %3771 = vmatpush3.bf16.msra.mxu1 %v3770_v28 }
 0x701   : > { %3747 = vmatpush3.bf16.msra.mxu0 %v3746_v60  ;;  %3772 = vmatprep.subr.bf16.mxu1 %v4539_v45 }
 0x702   : > { %3748 = vmatprep.subr.bf16.mxu0 %v4539_v45 }
 0x705   : > { %3750 = vmatpush3.bf16.msra.mxu0 %v3749_v5 }
 0x706   : > { %3751 = vmatprep.subr.bf16.mxu0 %v4539_v45 }
 0x709   : > { %3753 = vmatpush3.bf16.msra.mxu0 %v3752_v7 }
 0x70a   : > { %3754 = vmatprep.subr.bf16.mxu0 %v4539_v45 }
 0x7c5   : > { %v3298_v23 = vpop.f32.mrb[14].mxu0  ;;  %v3333_v30 = vpop.f32.mrb[14].mxu1 }
 0x7c6   : > { %v3299_v36 = vpop.f32.mrb[15].mxu0  ;;  %v3334_v33 = vpop.f32.mrb[15].mxu1 }
 0x7c7   : > { %v3300_v39 = vadd.f32 %v3299_v36, %v3298_v23  ;;  %v3335_v43 = vadd.f32 %v3334_v33, %v3333_v30  ;;  %v3773_v23 = vpack.c.bf16 %v2883_v44, %v2882_v29  ;;  %v2884_v30 = vld [vmem:[#allocation24 + $0x50] sm:$0xff]  ;;  %v2886_v33 = vld [vmem:[#allocation24 + $0x60] sm:$0xff] }
 0x7c9   : > { %v2674_v32 = vadd.f32 %v3300_v39, %v3241_v31  ;;  %3774 = vmatpush3.bf16.msra.mxu1 %v3773_v23  ;;  %v2885_v31 = vld [vmem:[#allocation24 + $0x58] sm:$0xff]  ;;  %v2887_v39 = vld [vmem:[#allocation24 + $0x68] sm:$0xff] }
 0x7ca   : > { %3775 = vmatprep.subr.bf16.mxu1 %v4539_v45  ;;  %v3776_v36 = vpack.c.bf16 %v2885_v31, %v2884_v30 }
 0x7cb   : > { %v2744_v38 = vadd.f32 %v3335_v43, %v2674_v32  ;;  %v3779_v43 = vpack.c.bf16 %v2887_v39, %v2886_v33  ;;  %v2888_v32 = vld [vmem:[#allocation24 + $0x70] sm:$0xff] }
 0x7cd   : > { %v5254_v35 = vadd.f32 %v4010_v34, %v2744_v38  ;;  %3777 = vmatpush3.bf16.msra.mxu1 %v3776_v36  ;;  %v2889_v38 = vld [vmem:[#allocation24 + $0x78] sm:$0xff] }
 0x7ce   : > { %3778 = vmatprep.subr.bf16.mxu1 %v4539_v45  ;;  %v3782_v34 = vpack.c.bf16 %v2889_v38, %v2888_v32 }
 0x7cf   : > { %2750 = vadd.xlane.f32.xlu0 %v5254_v35 }
 0x7d1   : > { %3780 = vmatpush3.bf16.msra.mxu1 %v3779_v43 }
 0x7d2   : > { %3781 = vmatprep.subr.bf16.mxu1 %v4539_v45 }
 0x7d5   : > { %3783 = vmatpush3.bf16.msra.mxu1 %v3782_v34 }
 0x85c   : > { %v2751_v53 = vpop.xlane.xlu0 %2750 }
 0x85d   : > { %v2752_v54 = vmul.f32 0.03125, %v2751_v53 }
 0x85f   : > { %v2753_v55 = vsub.f32 %v5254_v35, %v2752_v54 }
 0x861   : > { %v2754_v56 = vmul.f32 %v5086_v42, %v2753_v55  ;;  %v3755_v42 = vpack.c.bf16 %v2789_v9, %v2788_v8 }
 0x863   : > { %v2755_v57 = vmul.f32 %v2754_v56, %v2754_v56  ;;  %3756 = vmatpush3.bf16.msra.mxu0 %v3755_v42 }
 0x864   : > { %3757 = vmatprep.subr.bf16.mxu0 %v4539_v45  ;;  %v3245_v45 = vld [vmem:[#allocation25] ss:$0 sm:$0xff] }
 0x865   : > { %2756 = vadd.xlane.f32.xlu1 %v2755_v57 }
 0x867   : > { %3759 = vmatpush3.bf16.msra.mxu0 %v3758_v12 }
 0x8f2   : > { %v2757_v22 = vpop.xlane.xlu1 %2756 }
 0x8f3   : > { %v2758_v24 = vmul.f32 0.03125, %v2757_v22 }
 0x8f5   : > { %v2759_v46 = vadd.f32 1e-05, %v2758_v24 }
 0x8f7   : > { %4006 = vrsqrt.f32 %v2759_v46 }
 0x901   : > { %v4007_v25 = vpop.eup %4006 }
 0x902   : > { %v2761_v26 = vmul.f32 %v4007_v25, %v2754_v56 }
 0x904   : > { %v2768_v62 = vmul.f32 %v3242_v37, %v2761_v26 }
 0x906   : > { %v2775_v2 = vadd.f32 %v3243_v61, %v2768_v62 }
 0x908   : > { %3443 = vmatmul.mubr.f32.vlgmr.msra.gmra.mrb[16].mxu0 %v2775_v2 }
 0x9db   : > { %v2865_v40 = vpop.f32.mrb[16].mxu0 }
 0x9dc   : > { %v2866_v41 = vadd.f32 %v3244_v49, %v2865_v40  ;;  %v3444_v1 = vpop.f32.mrb[17].mxu0 }
 0x9de   : > { %v2870_v47 = vmul.f32 0.70710677, %v2866_v41  ;;  %v2869_v50 = vmul.f32 0.5, %v2866_v41 }
 0x9e0   : > { %4008 = verf.f32 %v2870_v47 }
 0x9ea   : > { %v4009_v48 = vpop.eup %4008 }
 0x9eb   : > { %v2872_v51 = vadd.f32 1.0, %v4009_v48 }
 0x9ed   : > { %v2873_v52 = vmul.f32 %v2872_v51, %v2869_v50 }
 0x9ef   : > { %3478 = vmatmul.mubr.f32.vlgmr.msra.gmra.mrb[16].mxu1 %v2873_v52 }
 0xac2   : > { %v2963_v53 = vpop.f32.mrb[16].mxu1 }
 0xac3   : > { %v2964_v54 = vadd.f32 %v3245_v45, %v2963_v53  ;;  %v3479_v55 = vpop.f32.mrb[17].mxu1 }
 0xac5   : > { %v2967_v56 = vadd.f32 %v2964_v54, %v5254_v35 }
 0xac7   : > { %2968 = vst [vmem:[%s671_s24] sm:$0xff] %v2967_v56 }
 0xac8   : > { %4418 = shalt.err (!%p4415_p8)
}
 0xac9   : > { %s4419_s25 = scalar_lea.hbm %s5282_s0, 128  ;;  %s4423_s28 = scalar_lea.hbm %s5394_s2, 256 }
 0xaca   : > { %p4420_p3 = scmp.ne.s32.totalorder %s5282_s0, %s4419_s25  ;;  %p4424_p0 = scmp.lt.u32.totalorder %s5282_s0, %s5394_s2 }
 0xacb   : > { %p4425_p11 = scmp.lt.u32.totalorder %s4423_s28, %s4419_s25  ;;  %p4427_p6 = scmp.lt.u32.totalorder %s4419_s25, %s5282_s0 }
 0xacc   : > { %p4421_p12 = pnand %p4420_p3, %p5395_p5 }
 0xacd   : > { %p4426_p7 = por %p4425_p11, %p4424_p0 }
 0xace   : > { %p4422_p13 = pneg %p4421_p12 }
 0xacf   : > { %p4428_p10 = por %p4427_p6, %p4426_p7 }
 0xad1   : > { %p4429_p1 = pnand %p4428_p10, %p4422_p13 }
 0xad3   : > { %4432 = shalt.err (!%p4429_p1)
}
 0xad4   : > { %3838 = dma.vmem_to_hbm [thread:$0]  (%p5395_p5), %s5284_s20, 128, %s5282_s0, %s2970_s14  }
 0xad5 PF: > { %s5396_s21 = sld [smem:[#allocation37_spill]]  ;;  %p5397_p2 = scmp.ne.s32.totalorder %s5385_s19, 0 }
 0xad6   : > { %p5398_p4 = scmp.ge.s32.totalorder %s4515_s18, 2 }
 0xad8   : > { %p3885_p9 = pnand %p5398_p4, %p5397_p2 }
 0xadb   : > { %s2996_s29 = sand.u32 1, %s5396_s21  }
 0xadc   : > { %s2997_s15 = scalar_lea.sflag [#allocation6], %s2996_s29 }
 0xadd   : > { %4490 = dma.done.wait (!%p3885_p9), %s2997_s15, 128  }
 0xade   : > { %4492 = vsyncadd (!%p3885_p9), %s2997_s15, 4294967168  ;;  %s37_s18 = sadd.s32 1, %s4515_s18   ;;  %s5399_s29 = sld [smem:[#allocation38_spill]] }
 0xadf   : > { %p34_p8 = scmp.ge.s32.totalorder %s37_s18, 4   ;;  %s5400_s30 = sld [smem:[#allocation39_spill]] }
 0xae0   : > { %s5401_s15 = smov %s4988_s27  ;;  %s5402_s16 = smov %s4511_s17 }
 0xae1   : > { %s5403_s17 = smov %s5405_s23  ;;  %36 = sbr.rel (!%p34_p8) target bundleno = 18 (0x12), region = 178 }
 0xae8   :  { %3002 = vsyncpa [#allocation5], 1 }
 0xae9   :  { %3004 = vsyncpa [#allocation5 + $0x1], 1 }
 0xaea   :  { %3005 = vsyncpa [#allocation8], 1 }
 0xaeb   :  { %3006 = vsyncpa [#allocation11], 1 }
 0xaec   :  { %3007 = vsyncpa [#allocation14], 1 }
 0xaed   :  { %3008 = vsyncpa [#allocation17], 1 }
 0xaee   :  { %3009 = vsyncpa [#allocation20], 1 }
 0xaef   :  { %3010 = vsyncpa [#allocation23], 1 }
 0xaf0   :  { %3011 = vsyncpa [#allocation26], 1 }
 0xaf1   :  { %3012 = vsyncpa [#allocation6], 1 }
 0xaf2   :  { %3014 = vsyncpa [#allocation6 + $0x1], 1 }

</bundles_post_ra>
